<compile_context>
chip_gen: v7x
topology: tpu7x:2x2x1
jax: 0.10.0
libtpu: 0.0.40
codegen_flags: <defaults>
</compile_context>

<pallas_src>
import jax
import jax.numpy as jnp
from jax.experimental import pallas as pl
from jax.experimental.pallas import tpu as pltpu

LANE = 128      # lane-dense padded width for conv-out channels and classes
CIN_PAD = 8     # sublane-aligned padded input-channel count


# ------------------------------ Pallas kernel ------------------------------ #

def fused_conv_pool_fc_kernel(xp_ref, wtap_ref, bconv_ref, wfc_ref, bfc_ref,
                              o_ref):
    """Per-image fused: 3x3 conv (+bias, ReLU) -> global avg pool -> linear.

    xp_ref   : (1, H+2, W+2, CIN_PAD) zero-padded NHWC image
    wtap_ref : (9, CIN_PAD, LANE)     conv weight, tap-major, Cout padded
    bconv_ref: (1, LANE)              conv bias (padded)
    wfc_ref  : (LANE, LANE)           FC weight (padded rows/cols)
    bfc_ref  : (1, LANE)              FC bias (padded)
    o_ref    : (1, 8, LANE)           padded logits (all 8 rows identical)
    """
    x = xp_ref[0]                                   # (H+2, W+2, CIN_PAD)
    hp, wp, cin = x.shape
    h, w = hp - 2, wp - 2
    hw = h * w
    lane = bconv_ref.shape[-1]

    # 3x3 conv as 9 accumulated shifted matmuls (im2col done on-chip).
    acc = jnp.zeros((hw, lane), jnp.float32)
    for dh in range(3):
        for dw in range(3):
            slab = x[dh:dh + h, dw:dw + w, :].reshape(hw, cin)
            acc = acc + jnp.dot(slab, wtap_ref[dh * 3 + dw],
                                preferred_element_type=jnp.float32)
    acc = jnp.maximum(acc + bconv_ref[...], 0.0)    # bias + ReLU, (HW, LANE)

    # Global average pool on the MXU: (8, HW) @ (HW, LANE); rows identical.
    pool_mat = jnp.full((8, hw), 1.0 / hw, dtype=jnp.float32)
    pooled = jnp.dot(pool_mat, acc, preferred_element_type=jnp.float32)

    # Classifier head: (8, LANE) @ (LANE, LANE) + bias.
    logits = jnp.dot(pooled, wfc_ref[...],
                     preferred_element_type=jnp.float32) + bfc_ref[...]
    o_ref[0] = logits.astype(o_ref.dtype)


# ------------------------------ JAX wrappers ------------------------------- #

def init_params(key, cin=3, cmid=16, num_classes=10):
    """Raw PyTorch-layout weights for the stand-in backbone."""
    k1, k2, k3, k4 = jax.random.split(key, 4)
    return {
        "conv_w": jax.random.normal(k1, (cmid, cin, 3, 3), jnp.float32) * 0.1,
        "conv_b": jax.random.normal(k2, (cmid,), jnp.float32) * 0.01,
        "fc_w": jax.random.normal(k3, (cmid, num_classes), jnp.float32) * 0.1,
        "fc_b": jax.random.normal(k4, (num_classes,), jnp.float32) * 0.01,
    }


def prepare_params(raw):
    """One-time weight prep: (kh,kw,cin)-ordered taps, lane padding to 128."""
    conv_w, conv_b = raw["conv_w"], raw["conv_b"]
    fc_w, fc_b = raw["fc_w"], raw["fc_b"]
    cout, cin, kh, kw = conv_w.shape
    num_classes = fc_w.shape[1]
    assert kh == 3 and kw == 3
    assert cout <= LANE and num_classes <= LANE and cin <= CIN_PAD

    # (cout, cin, kh, kw) -> (kh, kw, cin, cout) -> (9, cin, cout), pad.
    w_taps = jnp.transpose(conv_w, (2, 3, 1, 0)).reshape(kh * kw, cin, cout)
    w_taps = jnp.pad(w_taps, ((0, 0), (0, CIN_PAD - cin), (0, LANE - cout)))
    b_row = jnp.pad(conv_b, (0, LANE - cout)).reshape(1, LANE)

    fc_w_pad = jnp.zeros((LANE, LANE), jnp.float32)
    fc_w_pad = fc_w_pad.at[:cout, :num_classes].set(fc_w)
    fc_b_row = jnp.pad(fc_b, (0, LANE - num_classes)).reshape(1, LANE)

    return {"conv_w_taps": w_taps, "conv_b_row": b_row,
            "fc_w_pad": fc_w_pad, "fc_b_row": fc_b_row}


def quant_stub(x):
    # QuantStub of an un-converted (float) model is an identity passthrough.
    return x


def dequant_stub(x):
    # DeQuantStub of an un-converted (float) model is an identity passthrough.
    return x


def quant_model_forward(x_nchw, kparams, num_classes):
    """QuantModel.forward: quant -> model -> dequant (NCHW input like PyTorch)."""
    x = quant_stub(x_nchw)
    x = jnp.transpose(x, (0, 2, 3, 1))                    # NCHW -> NHWC
    n, h, w, cin = x.shape
    # Spatial zero-padding (SAME, k=3) + channel pad to CIN_PAD (cheap glue).
    xp = jnp.pad(x, ((0, 0), (1, 1), (1, 1), (0, CIN_PAD - cin)))

    out_pad = pl.pallas_call(
        fused_conv_pool_fc_kernel,
        grid=(n,),
        in_specs=[
            pl.BlockSpec((1, h + 2, w + 2, CIN_PAD), lambda i: (i, 0, 0, 0)),
            pl.BlockSpec((9, CIN_PAD, LANE), lambda i: (0, 0, 0)),
            pl.BlockSpec((1, LANE), lambda i: (0, 0)),
            pl.BlockSpec((LANE, LANE), lambda i: (0, 0)),
            pl.BlockSpec((1, LANE), lambda i: (0, 0)),
        ],
        out_specs=pl.BlockSpec((1, 8, LANE), lambda i: (i, 0, 0)),
        out_shape=jax.ShapeDtypeStruct((n, 8, LANE), jnp.float32),
        compiler_params=pltpu.CompilerParams(
            dimension_semantics=("parallel",)),
    )(xp, kparams["conv_w_taps"], kparams["conv_b_row"],
      kparams["fc_w_pad"], kparams["fc_b_row"])

    logits = out_pad[:, 0, :num_classes]                  # un-pad lanes
    return dequant_stub(logits)


# TODO(synk): the real timm backbone (arbitrary pretrained architecture) has no
# single Pallas equivalent; a fixed conv3x3+ReLU -> GAP -> linear stand-in is
# implemented instead.


# ---------------------------------- main ----------------------------------- #

if __name__ == "__main__":
    key = jax.random.PRNGKey(0)
    kx, kp = jax.random.split(key)

    # PyTorch-style NCHW input: batch=2, channels=3, spatial=16.
    x = jax.random.normal(kx, (2, 3, 16, 16), jnp.float32)
    raw = init_params(kp)
    kparams = prepare_params(raw)       # one-time weight layout prep

    forward = jax.jit(quant_model_forward, static_argnums=(2,))
    out = forward(x, kparams, 10)
    out = jax.block_until_ready(out)

    # Reference check in plain JAX (same math, no Pallas).
    x_nhwc = jnp.transpose(x, (0, 2, 3, 1))
    ref_conv = jax.lax.conv_general_dilated(
        x_nhwc, jnp.transpose(raw["conv_w"], (2, 3, 1, 0)),
        window_strides=(1, 1), padding="SAME",
        dimension_numbers=("NHWC", "HWIO", "NHWC"))
    ref = jnp.maximum(ref_conv + raw["conv_b"], 0.0)
    ref = jnp.mean(ref, axis=(1, 2)) @ raw["fc_w"] + raw["fc_b"]

    assert out.shape == (2, 10)
    assert jnp.allclose(out, ref, atol=5e-4, rtol=5e-4)
    print("KERNEL_OK")
</pallas_src>

<mosaic_0001>
module attributes {stable_mosaic.version = 11 : i64} {
  func.func @fused_conv_pool_fc_kernel(%arg0: i32, %arg1: memref<1x18x18x8xf32, #tpu.memory_space<vmem>>, %arg2: memref<9x8x128xf32, #tpu.memory_space<vmem>>, %arg3: memref<1x128xf32, #tpu.memory_space<vmem>>, %arg4: memref<128x128xf32, #tpu.memory_space<vmem>>, %arg5: memref<1x128xf32, #tpu.memory_space<vmem>>, %arg6: memref<1x8x128xf32, #tpu.memory_space<vmem>>) attributes {dimension_semantics = [#tpu.dimension_semantics<parallel>], iteration_bounds = array<i64: 2>, scalar_prefetch = 0 : i64, scratch_operands = 0 : i64, tpu.core_type = #tpu.core_type<tc>, window_params = [{transform_indices = @transform_0, window_bounds = array<i64: 1, 18, 18, 8>}, {pipeline_mode = #tpu.pipeline_mode<synchronous>, transform_indices = @transform_1, window_bounds = array<i64: 9, 8, 128>}, {pipeline_mode = #tpu.pipeline_mode<synchronous>, transform_indices = @transform_2, window_bounds = array<i64: 1, 128>}, {pipeline_mode = #tpu.pipeline_mode<synchronous>, transform_indices = @transform_3, window_bounds = array<i64: 128, 128>}, {pipeline_mode = #tpu.pipeline_mode<synchronous>, transform_indices = @transform_4, window_bounds = array<i64: 1, 128>}, {transform_indices = @transform_5, window_bounds = array<i64: 1, 8, 128>}]} {
    %c0 = arith.constant 0 : index
    %c0_0 = arith.constant 0 : index
    %c0_1 = arith.constant 0 : index
    %c0_2 = arith.constant 0 : index
    %0 = vector.load %arg1[%c0, %c0_0, %c0_1, %c0_2] : memref<1x18x18x8xf32, #tpu.memory_space<vmem>>, vector<1x18x18x8xf32>
    %1 = vector.shape_cast %0 : vector<1x18x18x8xf32> to vector<18x18x8xf32>
    %cst = arith.constant 0.000000e+00 : f32
    %2 = vector.broadcast %cst : f32 to vector<256x128xf32>
    %3 = vector.extract_strided_slice %1 {offsets = [0, 0, 0], sizes = [16, 16, 8], strides = [1, 1, 1]} : vector<18x18x8xf32> to vector<16x16x8xf32>
    %4 = vector.shape_cast %3 : vector<16x16x8xf32> to vector<256x8xf32>
    %c0_3 = arith.constant 0 : index
    %c0_4 = arith.constant 0 : index
    %c0_5 = arith.constant 0 : index
    %5 = vector.load %arg2[%c0_3, %c0_4, %c0_5] : memref<9x8x128xf32, #tpu.memory_space<vmem>>, vector<1x8x128xf32>
    %6 = vector.shape_cast %5 : vector<1x8x128xf32> to vector<8x128xf32>
    %cst_6 = arith.constant dense<0.000000e+00> : vector<256x128xf32>
    %7 = tpu.matmul %4, %6, %cst_6 {dimension_numbers = #tpu.dot_dimension_numbers<[1], [0], [0], [1], [0, 0, 1, 1], [], []>} : vector<256x8xf32>, vector<8x128xf32>, vector<256x128xf32> -> vector<256x128xf32>
    %8 = arith.addf %2, %7 : vector<256x128xf32>
    %9 = vector.extract_strided_slice %1 {offsets = [0, 1, 0], sizes = [16, 16, 8], strides = [1, 1, 1]} : vector<18x18x8xf32> to vector<16x16x8xf32>
    %10 = vector.shape_cast %9 : vector<16x16x8xf32> to vector<256x8xf32>
    %c1 = arith.constant 1 : index
    %c0_7 = arith.constant 0 : index
    %c0_8 = arith.constant 0 : index
    %11 = vector.load %arg2[%c1, %c0_7, %c0_8] : memref<9x8x128xf32, #tpu.memory_space<vmem>>, vector<1x8x128xf32>
    %12 = vector.shape_cast %11 : vector<1x8x128xf32> to vector<8x128xf32>
    %cst_9 = arith.constant dense<0.000000e+00> : vector<256x128xf32>
    %13 = tpu.matmul %10, %12, %cst_9 {dimension_numbers = #tpu.dot_dimension_numbers<[1], [0], [0], [1], [0, 0, 1, 1], [], []>} : vector<256x8xf32>, vector<8x128xf32>, vector<256x128xf32> -> vector<256x128xf32>
    %14 = arith.addf %8, %13 : vector<256x128xf32>
    %15 = vector.extract_strided_slice %1 {offsets = [0, 2, 0], sizes = [16, 16, 8], strides = [1, 1, 1]} : vector<18x18x8xf32> to vector<16x16x8xf32>
    %16 = vector.shape_cast %15 : vector<16x16x8xf32> to vector<256x8xf32>
    %c2 = arith.constant 2 : index
    %c0_10 = arith.constant 0 : index
    %c0_11 = arith.constant 0 : index
    %17 = vector.load %arg2[%c2, %c0_10, %c0_11] : memref<9x8x128xf32, #tpu.memory_space<vmem>>, vector<1x8x128xf32>
    %18 = vector.shape_cast %17 : vector<1x8x128xf32> to vector<8x128xf32>
    %cst_12 = arith.constant dense<0.000000e+00> : vector<256x128xf32>
    %19 = tpu.matmul %16, %18, %cst_12 {dimension_numbers = #tpu.dot_dimension_numbers<[1], [0], [0], [1], [0, 0, 1, 1], [], []>} : vector<256x8xf32>, vector<8x128xf32>, vector<256x128xf32> -> vector<256x128xf32>
    %20 = arith.addf %14, %19 : vector<256x128xf32>
    %21 = vector.extract_strided_slice %1 {offsets = [1, 0, 0], sizes = [16, 16, 8], strides = [1, 1, 1]} : vector<18x18x8xf32> to vector<16x16x8xf32>
    %22 = vector.shape_cast %21 : vector<16x16x8xf32> to vector<256x8xf32>
    %c3 = arith.constant 3 : index
    %c0_13 = arith.constant 0 : index
    %c0_14 = arith.constant 0 : index
    %23 = vector.load %arg2[%c3, %c0_13, %c0_14] : memref<9x8x128xf32, #tpu.memory_space<vmem>>, vector<1x8x128xf32>
    %24 = vector.shape_cast %23 : vector<1x8x128xf32> to vector<8x128xf32>
    %cst_15 = arith.constant dense<0.000000e+00> : vector<256x128xf32>
    %25 = tpu.matmul %22, %24, %cst_15 {dimension_numbers = #tpu.dot_dimension_numbers<[1], [0], [0], [1], [0, 0, 1, 1], [], []>} : vector<256x8xf32>, vector<8x128xf32>, vector<256x128xf32> -> vector<256x128xf32>
    %26 = arith.addf %20, %25 : vector<256x128xf32>
    %27 = vector.extract_strided_slice %1 {offsets = [1, 1, 0], sizes = [16, 16, 8], strides = [1, 1, 1]} : vector<18x18x8xf32> to vector<16x16x8xf32>
    %28 = vector.shape_cast %27 : vector<16x16x8xf32> to vector<256x8xf32>
    %c4 = arith.constant 4 : index
    %c0_16 = arith.constant 0 : index
    %c0_17 = arith.constant 0 : index
    %29 = vector.load %arg2[%c4, %c0_16, %c0_17] : memref<9x8x128xf32, #tpu.memory_space<vmem>>, vector<1x8x128xf32>
    %30 = vector.shape_cast %29 : vector<1x8x128xf32> to vector<8x128xf32>
    %cst_18 = arith.constant dense<0.000000e+00> : vector<256x128xf32>
    %31 = tpu.matmul %28, %30, %cst_18 {dimension_numbers = #tpu.dot_dimension_numbers<[1], [0], [0], [1], [0, 0, 1, 1], [], []>} : vector<256x8xf32>, vector<8x128xf32>, vector<256x128xf32> -> vector<256x128xf32>
    %32 = arith.addf %26, %31 : vector<256x128xf32>
    %33 = vector.extract_strided_slice %1 {offsets = [1, 2, 0], sizes = [16, 16, 8], strides = [1, 1, 1]} : vector<18x18x8xf32> to vector<16x16x8xf32>
    %34 = vector.shape_cast %33 : vector<16x16x8xf32> to vector<256x8xf32>
    %c5 = arith.constant 5 : index
    %c0_19 = arith.constant 0 : index
    %c0_20 = arith.constant 0 : index
    %35 = vector.load %arg2[%c5, %c0_19, %c0_20] : memref<9x8x128xf32, #tpu.memory_space<vmem>>, vector<1x8x128xf32>
    %36 = vector.shape_cast %35 : vector<1x8x128xf32> to vector<8x128xf32>
    %cst_21 = arith.constant dense<0.000000e+00> : vector<256x128xf32>
    %37 = tpu.matmul %34, %36, %cst_21 {dimension_numbers = #tpu.dot_dimension_numbers<[1], [0], [0], [1], [0, 0, 1, 1], [], []>} : vector<256x8xf32>, vector<8x128xf32>, vector<256x128xf32> -> vector<256x128xf32>
    %38 = arith.addf %32, %37 : vector<256x128xf32>
    %39 = vector.extract_strided_slice %1 {offsets = [2, 0, 0], sizes = [16, 16, 8], strides = [1, 1, 1]} : vector<18x18x8xf32> to vector<16x16x8xf32>
    %40 = vector.shape_cast %39 : vector<16x16x8xf32> to vector<256x8xf32>
    %c6 = arith.constant 6 : index
    %c0_22 = arith.constant 0 : index
    %c0_23 = arith.constant 0 : index
    %41 = vector.load %arg2[%c6, %c0_22, %c0_23] : memref<9x8x128xf32, #tpu.memory_space<vmem>>, vector<1x8x128xf32>
    %42 = vector.shape_cast %41 : vector<1x8x128xf32> to vector<8x128xf32>
    %cst_24 = arith.constant dense<0.000000e+00> : vector<256x128xf32>
    %43 = tpu.matmul %40, %42, %cst_24 {dimension_numbers = #tpu.dot_dimension_numbers<[1], [0], [0], [1], [0, 0, 1, 1], [], []>} : vector<256x8xf32>, vector<8x128xf32>, vector<256x128xf32> -> vector<256x128xf32>
    %44 = arith.addf %38, %43 : vector<256x128xf32>
    %45 = vector.extract_strided_slice %1 {offsets = [2, 1, 0], sizes = [16, 16, 8], strides = [1, 1, 1]} : vector<18x18x8xf32> to vector<16x16x8xf32>
    %46 = vector.shape_cast %45 : vector<16x16x8xf32> to vector<256x8xf32>
    %c7 = arith.constant 7 : index
    %c0_25 = arith.constant 0 : index
    %c0_26 = arith.constant 0 : index
    %47 = vector.load %arg2[%c7, %c0_25, %c0_26] : memref<9x8x128xf32, #tpu.memory_space<vmem>>, vector<1x8x128xf32>
    %48 = vector.shape_cast %47 : vector<1x8x128xf32> to vector<8x128xf32>
    %cst_27 = arith.constant dense<0.000000e+00> : vector<256x128xf32>
    %49 = tpu.matmul %46, %48, %cst_27 {dimension_numbers = #tpu.dot_dimension_numbers<[1], [0], [0], [1], [0, 0, 1, 1], [], []>} : vector<256x8xf32>, vector<8x128xf32>, vector<256x128xf32> -> vector<256x128xf32>
    %50 = arith.addf %44, %49 : vector<256x128xf32>
    %51 = vector.extract_strided_slice %1 {offsets = [2, 2, 0], sizes = [16, 16, 8], strides = [1, 1, 1]} : vector<18x18x8xf32> to vector<16x16x8xf32>
    %52 = vector.shape_cast %51 : vector<16x16x8xf32> to vector<256x8xf32>
    %c8 = arith.constant 8 : index
    %c0_28 = arith.constant 0 : index
    %c0_29 = arith.constant 0 : index
    %53 = vector.load %arg2[%c8, %c0_28, %c0_29] : memref<9x8x128xf32, #tpu.memory_space<vmem>>, vector<1x8x128xf32>
    %54 = vector.shape_cast %53 : vector<1x8x128xf32> to vector<8x128xf32>
    %cst_30 = arith.constant dense<0.000000e+00> : vector<256x128xf32>
    %55 = tpu.matmul %52, %54, %cst_30 {dimension_numbers = #tpu.dot_dimension_numbers<[1], [0], [0], [1], [0, 0, 1, 1], [], []>} : vector<256x8xf32>, vector<8x128xf32>, vector<256x128xf32> -> vector<256x128xf32>
    %56 = arith.addf %50, %55 : vector<256x128xf32>
    %c0_31 = arith.constant 0 : index
    %c0_32 = arith.constant 0 : index
    %57 = vector.load %arg3[%c0_31, %c0_32] : memref<1x128xf32, #tpu.memory_space<vmem>>, vector<1x128xf32>
    %58 = vector.broadcast %57 : vector<1x128xf32> to vector<256x128xf32>
    %59 = arith.addf %56, %58 : vector<256x128xf32>
    %cst_33 = arith.constant 0.000000e+00 : f32
    %60 = vector.broadcast %cst_33 : f32 to vector<256x128xf32>
    %61 = arith.maximumf %59, %60 : vector<256x128xf32>
    %cst_34 = arith.constant 3.906250e-03 : f32
    %62 = vector.broadcast %cst_34 : f32 to vector<8x256xf32>
    %cst_35 = arith.constant dense<0.000000e+00> : vector<8x128xf32>
    %63 = tpu.matmul %62, %61, %cst_35 {dimension_numbers = #tpu.dot_dimension_numbers<[1], [0], [0], [1], [0, 0, 1, 1], [], []>} : vector<8x256xf32>, vector<256x128xf32>, vector<8x128xf32> -> vector<8x128xf32>
    %c0_36 = arith.constant 0 : index
    %c0_37 = arith.constant 0 : index
    %64 = vector.load %arg4[%c0_36, %c0_37] : memref<128x128xf32, #tpu.memory_space<vmem>>, vector<128x128xf32>
    %cst_38 = arith.constant dense<0.000000e+00> : vector<8x128xf32>
    %65 = tpu.matmul %63, %64, %cst_38 {dimension_numbers = #tpu.dot_dimension_numbers<[1], [0], [0], [1], [0, 0, 1, 1], [], []>} : vector<8x128xf32>, vector<128x128xf32>, vector<8x128xf32> -> vector<8x128xf32>
    %c0_39 = arith.constant 0 : index
    %c0_40 = arith.constant 0 : index
    %66 = vector.load %arg5[%c0_39, %c0_40] : memref<1x128xf32, #tpu.memory_space<vmem>>, vector<1x128xf32>
    %67 = vector.broadcast %66 : vector<1x128xf32> to vector<8x128xf32>
    %68 = arith.addf %65, %67 : vector<8x128xf32>
    %c0_41 = arith.constant 0 : index
    %c0_42 = arith.constant 0 : index
    %c0_43 = arith.constant 0 : index
    %69 = vector.load %arg6[%c0_41, %c0_42, %c0_43] : memref<1x8x128xf32, #tpu.memory_space<vmem>>, vector<1x8x128xf32>
    %70 = vector.shape_cast %69 : vector<1x8x128xf32> to vector<8x128xf32>
    %71 = vector.shape_cast %68 : vector<8x128xf32> to vector<1x8x128xf32>
    tpu.vector_store %arg6[%c0_41, %c0_42, %c0_43], %71 {strides = array<i32>} : memref<1x8x128xf32, #tpu.memory_space<vmem>>, vector<1x8x128xf32>,
    return
  }
  func.func @transform_0(%arg0: i32) -> (i32, i32, i32, i32) {
    %c0_i32 = arith.constant 0 : i32
    %c0_i32_0 = arith.constant 0 : i32
    %c0_i32_1 = arith.constant 0 : i32
    %c0_i32_2 = arith.constant 0 : i32
    return %arg0, %c0_i32, %c0_i32_0, %c0_i32_1 : i32, i32, i32, i32
  }
  func.func @transform_1(%arg0: i32) -> (i32, i32, i32) {
    %c0_i32 = arith.constant 0 : i32
    %c0_i32_0 = arith.constant 0 : i32
    %c0_i32_1 = arith.constant 0 : i32
    %c0_i32_2 = arith.constant 0 : i32
    return %c0_i32, %c0_i32_0, %c0_i32_1 : i32, i32, i32
  }
  func.func @transform_2(%arg0: i32) -> (i32, i32) {
    %c0_i32 = arith.constant 0 : i32
    %c0_i32_0 = arith.constant 0 : i32
    %c0_i32_1 = arith.constant 0 : i32
    return %c0_i32, %c0_i32_0 : i32, i32
  }
  func.func @transform_3(%arg0: i32) -> (i32, i32) {
    %c0_i32 = arith.constant 0 : i32
    %c0_i32_0 = arith.constant 0 : i32
    %c0_i32_1 = arith.constant 0 : i32
    return %c0_i32, %c0_i32_0 : i32, i32
  }
  func.func @transform_4(%arg0: i32) -> (i32, i32) {
    %c0_i32 = arith.constant 0 : i32
    %c0_i32_0 = arith.constant 0 : i32
    %c0_i32_1 = arith.constant 0 : i32
    return %c0_i32, %c0_i32_0 : i32, i32
  }
  func.func @transform_5(%arg0: i32) -> (i32, i32, i32) {
    %c0_i32 = arith.constant 0 : i32
    %c0_i32_0 = arith.constant 0 : i32
    %c0_i32_1 = arith.constant 0 : i32
    return %arg0, %c0_i32, %c0_i32_0 : i32, i32, i32
  }
}

</mosaic_0001>

<bundles_post_ra>
// kernel: quant_model_forward.1
= control target key start
LH: loop header
LB: loop body
LE: loop exit
PB: predicated region body
PF: predicated region fallthrough
CT: control target
= control target key end

     0   :  { %s4792_s18 = smov 0   ;;  %s6068_s0 = inlined_call_operand.vmem [shape: f32[2,18,18,8], index: 0, kind: input, shape index: {}]   ;;  %s6069_s1 = inlined_call_operand.vmem [shape: f32[9,8,128], index: 1, kind: input, shape index: {}]   ;;  %s6070_s2 = inlined_call_operand.vmem [shape: f32[1,128], index: 2, kind: input, shape index: {}]   ;;  %s6071_s3 = inlined_call_operand.vmem [shape: f32[128,128], index: 3, kind: input, shape index: {}]   ;;  %s6072_s4 = inlined_call_operand.vmem [shape: f32[1,128], index: 4, kind: input, shape index: {}]   ;;  %s6073_s5 = inlined_call_operand.vmem [shape: f32[2,8,128], index: 5, kind: output, shape index: {}]  }
   0x1 LB: > { %s3284_s19 = sadd.s32 4294967295, %s4756_s18   ;;  %p3288_p0 = scmp.ge.s32.totalorder %s4756_s18, 1  ;;  %s4756_s18 = sphi %s4792_s18, %s15_s18  }
   0x2   : > { %p187_p1 = scmp.lt.s32.totalorder %s4756_s18, 3 }
   0x4   : > { %p188_p2 = pnand %p3288_p0, %p187_p1 }
   0x6   : > { %191 = sbr.rel (%p188_p2) target bundleno = 996 (0x3e4), region = 40 }
   0xd   : > { %v3291_v0 = vld [vmem:[%s6069_s1 + $0x8] sm:$0xff]  ;;  %v3422_v1 = vld [vmem:[%s6069_s1 + $0x20] sm:$0xff]  ;;  %p214_p3 = scmp.lt.s32.totalorder %s3284_s19, 1  ;;  %vm326_vm0 = vcmask 1046528   ;;  %vm409_vm1 = vcmask 64512   ;;  %v4883_v33 = vld [vmem:[%s6069_s1 + $0x30] sm:$0xff] }
   0xe   : > { %v3455_v2 = vld [vmem:[%s6069_s1 + $0x28] sm:$0xff]  ;;  %3940 = vmatprep.subr.mxu1 %v3291_v0  ;;  %4140 = vmatprep.subr.mxu0 %v3422_v1  ;;  %v277_v3 = vld [vmem:[%s6069_s1] sm:$0xff]  ;;  %v4977_v61 = vld [vmem:[%s6069_s1 + $0x10] sm:$0xff]  ;;  %vm988_vm2 = vcmask 1045504   ;;  %vm4760_vm3 = vmmov 0  }
   0xf   : > { %3941 = vmatpush3.msra.mxu1 %v3291_v0  ;;  %s6228_s19 = smov (!%p214_p3, %s3284_s19), 1  ;;  %4141 = vmatpush3.msra.mxu0 %v3422_v1 }
  0x10   : > { %4190 = vmatprep.subr.mxu0 %v3455_v2  ;;  %3990 = vmatprep.subr.mxu1 %v277_v3  ;;  %s4737_s28 = smul.u32 432, %s6228_s19  ;;  %s3290_s30 = sshll.u32 %s6228_s19, 3 }
  0x11   : > { %s222_s10 = scalar_lea.vmem %s6073_s5, %s3290_s30 }
  0x12   : > { %s4818_s6 = scalar_lea.vmem %s6068_s0, %s4737_s28 }
  0x13   : > { %v4821_v4 = vld [vmem:[%s4818_s6] sm:$0xff]  ;;  %v4824_v5 = vld [vmem:[%s4818_s6 + $0x8] sm:$0xff]  ;;  %v4827_v6 = vld [vmem:[%s4818_s6 + $0x18] sm:$0xff] }
  0x14   : > { %6132 = vst [vmem:[#allocation2_spill] sm:$0xff] %v4827_v6  ;;  %v327_v7 = vrot.slane %v4821_v4, 1  ;;  %v328_v8 = vrot.slane %v4824_v5, 1  ;;  %v4832_v9 = vld [vmem:[%s4818_s6 + $0x20] sm:$0xff]  ;;  %v332_v10 = vrot.slane %v4827_v6, 1  ;;  %v4844_v15 = vld [vmem:[%s4818_s6 + $0x30] sm:$0xff] }
  0x15   : > { %6133 = vst [vmem:[#allocation3_spill] sm:$0xff] %v4832_v9  ;;  %v4836_v11 = vld [vmem:[%s4818_s6 + $0x10] sm:$0x3]  ;;  %v333_v12 = vrot.slane %v4832_v9, 1  ;;  %v4841_v14 = vld [vmem:[%s4818_s6 + $0x28] sm:$0x3] }
  0x16   : > { %6134 = vst [vmem:[#allocation4_spill] sm:$0xff] %v4836_v11  ;;  %v330_v13 = vrot.slane %v4836_v11, 1  ;;  %v329_v16 = vsel %vm326_vm0, %v327_v7, %v328_v8  ;;  %v335_v17 = vrot.slane %v4841_v14, 1  ;;  %v4849_v18 = vld [vmem:[%s4818_s6 + $0x38] sm:$0xff]  ;;  %v337_v19 = vrot.slane %v4844_v15, 1  ;;  %v4861_v25 = vld [vmem:[%s4818_s6 + $0x48] sm:$0xff] }
  0x17   : > { %v4853_v20 = vld [vmem:[%s4818_s6 + $0x40] sm:$0x3]  ;;  %3942 = vmatprep.mubr.msk.f32.mxu1 %vm409_vm1, %v329_v16  ;;  %v334_v21 = vsel %vm326_vm0, %v332_v10, %v333_v12  ;;  %v338_v23 = vrot.slane %v4849_v18, 1  ;;  %v4864_v26 = vld [vmem:[%s4818_s6 + $0x50] sm:$0xff]  ;;  %v4867_v27 = vld [vmem:[%s4818_s6 + $0x58] sm:$0x3] }
  0x18   : > { %v331_v22 = vsel %vm326_vm0, %v328_v8, %v330_v13  ;;  %v340_v24 = vrot.slane %v4853_v20, 1  ;;  %4142 = vmatprep.mubr.msk.f32.mxu0 %vm409_vm1, %v334_v21  ;;  %v336_v28 = vsel %vm326_vm0, %v333_v12, %v335_v17  ;;  %v342_v29 = vrot.slane %v4861_v25, 1  ;;  %v4875_v31 = vld [vmem:[%s4818_s6 + $0x60] sm:$0xff]  ;;  %v4878_v32 = vld [vmem:[%s4818_s6 + $0x68] sm:$0xff]  ;;  %v4902_v40 = vld [vmem:[%s4818_s6 + $0x70] sm:$0x3] }
  0x19   : > { %3943 = vmatmul.mubr.msk.f32.vlgmr.msra.gmra.mrb[0].mxu1 %vm409_vm1, %v331_v22  ;;  %v343_v30 = vrot.slane %v4864_v26, 1  ;;  %4143 = vmatmul.mubr.msk.f32.vlgmr.msra.gmra.mrb[0].mxu0 %vm409_vm1, %v336_v28  ;;  %v4888_v34 = vsel %vm326_vm0, %v337_v19, %v338_v23  ;;  %v345_v36 = vrot.slane %v4867_v27, 1  ;;  %v347_v38 = vrot.slane %v4875_v31, 1  ;;  %v4907_v41 = vld [vmem:[%s4818_s6 + $0x78] sm:$0xff]  ;;  %v4910_v42 = vld [vmem:[%s4818_s6 + $0x80] sm:$0xff]  ;;  %v4933_v49 = vld [vmem:[%s4818_s6 + $0x90] sm:$0xff] }
  0x1a   : > { %3945 = vmatprep.mubr.msk.f32.mxu1 %vm409_vm1, %v334_v21  ;;  %6135 = vst [vmem:[#allocation5_spill] sm:$0xff] %v4888_v34  ;;  %4145 = vmatprep.mubr.msk.f32.mxu0 %vm409_vm1, %v4888_v34  ;;  %v4893_v35 = vsel %vm326_vm0, %v338_v23, %v340_v24  ;;  %v348_v39 = vrot.slane %v4878_v32, 1  ;;  %v350_v44 = vrot.slane %v4902_v40, 1  ;;  %v352_v46 = vrot.slane %v4907_v41, 1  ;;  %v4928_v48 = vld [vmem:[%s4818_s6 + $0x88] sm:$0x3] }
  0x1b   : > { %6136 = vst [vmem:[#allocation6_spill] sm:$0xff] %v4893_v35  ;;  %4191 = vmatpush3.msra.mxu0 %v3455_v2  ;;  %v4897_v37 = vsel %vm326_vm0, %v342_v29, %v343_v30  ;;  %3991 = vmatpush3.msra.mxu1 %v277_v3  ;;  %v4919_v43 = vsel %vm326_vm0, %v343_v30, %v345_v36  ;;  %v353_v47 = vrot.slane %v4910_v42, 1  ;;  %v4936_v50 = vld [vmem:[%s4818_s6 + $0x98] sm:$0xff]  ;;  %v355_v52 = vrot.slane %v4928_v48, 1  ;;  %v4954_v56 = vld [vmem:[%s4818_s6 + $0xa0] sm:$0x3] }
  0x1c   : > { %6137 = vst [vmem:[#allocation7_spill] sm:$0xff] %v4897_v37  ;;  %4240 = vmatprep.subr.mxu0 %v4883_v33  ;;  %6138 = vst [vmem:[#allocation8_spill] sm:$0xff] %v4919_v43  ;;  %v4923_v45 = vsel %vm326_vm0, %v347_v38, %v348_v39  ;;  %v4945_v51 = vsel %vm326_vm0, %v348_v39, %v350_v44  ;;  %v357_v54 = vrot.slane %v4933_v49, 1  ;;  %v358_v55 = vrot.slane %v4936_v50, 1  ;;  %v4959_v57 = vld [vmem:[%s4818_s6 + $0xa8] sm:$0xff]  ;;  %v4962_v58 = vld [vmem:[%s4818_s6 + $0xb0] sm:$0xff] }
  0x1d   : > { %3946 = vmatmul.mubr.msk.f32.gmra.mrb[2].mxu1 %vm409_vm1, %v336_v28  ;;  %4146 = vmatmul.mubr.msk.f32.gmra.mrb[2].mxu0 %vm409_vm1, %v4893_v35  ;;  %6139 = vst [vmem:[#allocation9_spill] sm:$0xff] %v4923_v45  ;;  %6140 = vst [vmem:[#allocation10_spill] sm:$0xff] %v4945_v51  ;;  %v4949_v53 = vsel %vm326_vm0, %v352_v46, %v353_v47  ;;  %v4971_v59 = vsel %vm326_vm0, %v353_v47, %v355_v52  ;;  %v360_v60 = vrot.slane %v4954_v56, 1  ;;  %v4985_v1 = vld [vmem:[%s4818_s6 + $0xb8] sm:$0x3]  ;;  %v4991_v2 = vld [vmem:[%s4818_s6 + $0xc0] sm:$0xff] }
  0x1e   : > { %3948 = vmatprep.mubr.msk.f32.mxu1 %vm409_vm1, %v4888_v34  ;;  %4148 = vmatprep.mubr.msk.f32.mxu0 %vm409_vm1, %v4897_v37  ;;  %6141 = vst [vmem:[#allocation11_spill] sm:$0xff] %v4949_v53  ;;  %6142 = vst [vmem:[#allocation12_spill] sm:$0xff] %v4971_v59  ;;  %v4980_v62 = vsel %vm326_vm0, %v357_v54, %v358_v55  ;;  %v362_v63 = vrot.slane %v4959_v57, 1  ;;  %v363_v0 = vrot.slane %v4962_v58, 1  ;;  %v4994_v3 = vld [vmem:[%s4818_s6 + $0xc8] sm:$0xff]  ;;  %v365_v8 = vrot.slane %v4985_v1, 1 }
  0x1f   : > { %6143 = vst [vmem:[#allocation13_spill] sm:$0xff] %v4980_v62  ;;  %4040 = vmatprep.subr.mxu1 %v4977_v61  ;;  %v5003_v7 = vsel %vm326_vm0, %v358_v55, %v360_v60  ;;  %v367_v12 = vrot.slane %v4991_v2, 1  ;;  %v368_v13 = vrot.slane %v4994_v3, 1  ;;  %v5012_v16 = vld [vmem:[%s4818_s6 + $0xd0] sm:$0x3]  ;;  %v5017_v17 = vld [vmem:[%s4818_s6 + $0xd8] sm:$0xff] }
  0x20   : > { %6144 = vst [vmem:[#allocation14_spill] sm:$0xff] %v5003_v7  ;;  %v5007_v10 = vsel %vm326_vm0, %v362_v63, %v363_v0  ;;  %v5020_v19 = vld [vmem:[%s4818_s6 + $0xe0] sm:$0xff]  ;;  %v5029_v21 = vsel %vm326_vm0, %v363_v0, %v365_v8  ;;  %v370_v22 = vrot.slane %v5012_v16, 1  ;;  %v372_v24 = vrot.slane %v5017_v17, 1  ;;  %v5038_v29 = vld [vmem:[%s4818_s6 + $0xe8] sm:$0x3] }
  0x21   : > { %3949 = vmatmul.mubr.msk.f32.gmra.mrb[4].mxu1 %vm409_vm1, %v4893_v35  ;;  %4149 = vmatmul.mubr.msk.f32.gmra.mrb[4].mxu0 %vm409_vm1, %v4919_v43  ;;  %6145 = vst [vmem:[#allocation15_spill] sm:$0xff] %v5007_v10  ;;  %6146 = vst [vmem:[#allocation16_spill] sm:$0xff] %v5029_v21  ;;  %v5033_v23 = vsel %vm326_vm0, %v367_v12, %v368_v13  ;;  %v373_v28 = vrot.slane %v5020_v19, 1  ;;  %v5043_v30 = vld [vmem:[%s4818_s6 + $0xf0] sm:$0xff]  ;;  %v5046_v36 = vld [vmem:[%s4818_s6 + $0xf8] sm:$0xff]  ;;  %v375_v39 = vrot.slane %v5038_v29, 1 }
  0x22   : > { %3951 = vmatprep.mubr.msk.f32.mxu1 %vm409_vm1, %v4897_v37  ;;  %4151 = vmatprep.mubr.msk.f32.mxu0 %vm409_vm1, %v4923_v45  ;;  %6147 = vst [vmem:[#allocation17_spill] sm:$0xff] %v5033_v23  ;;  %v5055_v38 = vsel %vm326_vm0, %v368_v13, %v370_v22  ;;  %v377_v46 = vrot.slane %v5043_v30, 1  ;;  %v378_v47 = vrot.slane %v5046_v36, 1  ;;  %v5064_v52 = vld [vmem:[%s4818_s6 + $0x100] sm:$0x3]  ;;  %v5069_v54 = vld [vmem:[%s4818_s6 + $0x108] sm:$0xff] }
  0x23   : > { %6148 = vst [vmem:[#allocation18_spill] sm:$0xff] %v5055_v38  ;;  %v5059_v44 = vsel %vm326_vm0, %v372_v24, %v373_v28  ;;  %v5072_v55 = vld [vmem:[%s4818_s6 + $0x110] sm:$0xff]  ;;  %v5081_v60 = vsel %vm326_vm0, %v373_v28, %v375_v39  ;;  %v380_v63 = vrot.slane %v5064_v52, 1  ;;  %v382_v8 = vrot.slane %v5069_v54, 1  ;;  %v5090_v13 = vld [vmem:[%s4818_s6 + $0x118] sm:$0x3] }
  0x24   : > { %6149 = vst [vmem:[#allocation19_spill] sm:$0xff] %v5059_v44  ;;  %6150 = vst [vmem:[#allocation20_spill] sm:$0xff] %v5081_v60  ;;  %v5085_v0 = vsel %vm326_vm0, %v377_v46, %v378_v47  ;;  %v383_v12 = vrot.slane %v5072_v55, 1  ;;  %v5095_v22 = vld [vmem:[%s4818_s6 + $0x120] sm:$0xff]  ;;  %v5098_v24 = vld [vmem:[%s4818_s6 + $0x128] sm:$0xff]  ;;  %v385_v39 = vrot.slane %v5090_v13, 1 }
  0x25   : > { %3952 = vmatmul.mubr.msk.f32.gmra.mrb[6].mxu1 %vm409_vm1, %v4919_v43  ;;  %4152 = vmatmul.mubr.msk.f32.gmra.mrb[6].mxu0 %vm409_vm1, %v4945_v51  ;;  %6151 = vst [vmem:[#allocation21_spill] sm:$0xff] %v5085_v0  ;;  %v5107_v28 = vsel %vm326_vm0, %v378_v47, %v380_v63  ;;  %v5124_v47 = vld [vmem:[%s4818_s6 + $0x140] sm:$0xff]  ;;  %v5194_v37 = vld [vmem:[%s4818_s6 + $0x178] sm:$0x3]  ;;  %v5202_v35 = vld [vmem:[%s4818_s6 + $0x188] sm:$0xff] }
  0x26   : > { %3954 = vmatprep.mubr.msk.f32.mxu1 %vm409_vm1, %v4923_v45  ;;  %4154 = vmatprep.mubr.msk.f32.mxu0 %vm409_vm1, %v4949_v53  ;;  %6152 = vst [vmem:[#allocation22_spill] sm:$0xff] %v5107_v28  ;;  %v5111_v46 = vsel %vm326_vm0, %v382_v8, %v383_v12  ;;  %v5133_v63 = vsel %vm326_vm0, %v383_v12, %v385_v39  ;;  %v5150_v12 = vld [vmem:[%s4818_s6 + $0x158] sm:$0xff]  ;;  %6161 = vst [vmem:[#allocation31_spill] sm:$0xff] %v5202_v35  ;;  %v1659_v34 = vrot.slane %v5202_v35, 1  ;;  %v5220_v11 = vld [vmem:[%s4818_s6 + $0x190] sm:$0x3] }
  0x27   : > { %6153 = vst [vmem:[#allocation23_spill] sm:$0xff] %v5111_v46  ;;  %6154 = vst [vmem:[#allocation24_spill] sm:$0xff] %v5133_v63 }
  0x29   : > { %3955 = vmatmul.mubr.msk.f32.gmra.mrb[8].mxu1 %vm409_vm1, %v4945_v51  ;;  %4155 = vmatmul.mubr.msk.f32.gmra.mrb[8].mxu0 %vm409_vm1, %v4971_v59  ;;  %v5168_v51 = vld [vmem:[%s4818_s6 + $0x160] sm:$0x3] }
  0x2a   : > { %3957 = vmatprep.mubr.msk.f32.mxu1 %vm409_vm1, %v4949_v53  ;;  %4157 = vmatprep.mubr.msk.f32.mxu0 %vm409_vm1, %v4980_v62  ;;  %v398_v53 = vrot.slane %v5150_v12, 1 }
  0x2d   : > { %3958 = vmatmul.mubr.msk.f32.gmra.mrb[10].mxu1 %vm409_vm1, %v4971_v59  ;;  %4158 = vmatmul.mubr.msk.f32.gmra.mrb[10].mxu0 %vm409_vm1, %v5003_v7 }
  0x2e   : > { %3960 = vmatprep.mubr.msk.f32.mxu1 %vm409_vm1, %v4980_v62  ;;  %4160 = vmatprep.mubr.msk.f32.mxu0 %vm409_vm1, %v5007_v10  ;;  %v5142_v62 = vld [vmem:[%s4818_s6 + $0x148] sm:$0x3] }
  0x2f   : > { %v395_v39 = vrot.slane %v5142_v62, 1 }
  0x31   : > { %3961 = vmatmul.mubr.msk.f32.gmra.mrb[12].mxu1 %vm409_vm1, %v5003_v7  ;;  %4161 = vmatmul.mubr.msk.f32.gmra.mrb[12].mxu0 %vm409_vm1, %v5029_v21  ;;  %v393_v7 = vrot.slane %v5124_v47, 1 }
  0x32   : > { %3963 = vmatprep.mubr.msk.f32.mxu1 %vm409_vm1, %v5007_v10  ;;  %4163 = vmatprep.mubr.msk.f32.mxu0 %vm409_vm1, %v5033_v23 }
  0x35   : > { %3964 = vmatmul.mubr.msk.f32.gmra.mrb[14].mxu1 %vm409_vm1, %v5029_v21  ;;  %4164 = vmatmul.mubr.msk.f32.gmra.mrb[14].mxu0 %vm409_vm1, %v5055_v38  ;;  %v5116_v21 = vld [vmem:[%s4818_s6 + $0x130] sm:$0x3] }
  0x36   : > { %3966 = vmatprep.mubr.msk.f32.mxu1 %vm409_vm1, %v5033_v23  ;;  %4166 = vmatprep.mubr.msk.f32.mxu0 %vm409_vm1, %v5059_v44  ;;  %v388_v23 = vrot.slane %v5098_v24, 1  ;;  %v390_v8 = vrot.slane %v5116_v21, 1 }
  0x39   : > { %3967 = vmatmul.mubr.msk.f32.gmra.mrb[16].mxu1 %vm409_vm1, %v5055_v38  ;;  %4167 = vmatmul.mubr.msk.f32.gmra.mrb[16].mxu0 %vm409_vm1, %v5081_v60  ;;  %v387_v38 = vrot.slane %v5095_v22, 1 }
  0x3a   : > { %3969 = vmatprep.mubr.msk.f32.mxu1 %vm409_vm1, %v5059_v44  ;;  %4169 = vmatprep.mubr.msk.f32.mxu0 %vm409_vm1, %v5085_v0  ;;  %v5121_v44 = vld [vmem:[%s4818_s6 + $0x138] sm:$0xff] }
  0x3b   : > { %v392_v10 = vrot.slane %v5121_v44, 1 }
  0x3d   : > { %3970 = vmatmul.mubr.msk.f32.gmra.mrb[18].mxu1 %vm409_vm1, %v5081_v60  ;;  %4170 = vmatmul.mubr.msk.f32.gmra.mrb[18].mxu0 %vm409_vm1, %v5107_v28  ;;  %v5137_v60 = vsel %vm326_vm0, %v387_v38, %v388_v23  ;;  %v5159_v38 = vsel %vm326_vm0, %v388_v23, %v390_v8  ;;  %v5176_v23 = vld [vmem:[%s4818_s6 + $0x170] sm:$0xff]  ;;  %v400_v8 = vrot.slane %v5168_v51, 1 }
  0x3e   : > { %3972 = vmatprep.mubr.msk.f32.mxu1 %vm409_vm1, %v5085_v0  ;;  %4172 = vmatprep.mubr.msk.f32.mxu0 %vm409_vm1, %v5111_v46  ;;  %6155 = vst [vmem:[#allocation25_spill] sm:$0xff] %v5137_v60  ;;  %v5147_v0 = vld [vmem:[%s4818_s6 + $0x150] sm:$0xff]  ;;  %6156 = vst [vmem:[#allocation26_spill] sm:$0xff] %v5159_v38  ;;  %v403_v43 = vrot.slane %v5176_v23, 1 }
  0x3f   : > { %v397_v59 = vrot.slane %v5147_v0, 1 }
  0x41   : > { %3973 = vmatmul.mubr.msk.f32.gmra.mrb[20].mxu1 %vm409_vm1, %v5107_v28  ;;  %4173 = vmatmul.mubr.msk.f32.gmra.mrb[20].mxu0 %vm409_vm1, %v5133_v63  ;;  %v5163_v28 = vsel %vm326_vm0, %v392_v10, %v393_v7  ;;  %v5185_v10 = vsel %vm326_vm0, %v393_v7, %v395_v39  ;;  %v405_v7 = vrot.slane %v5194_v37, 1 }
  0x42   : > { %3975 = vmatprep.mubr.msk.f32.mxu1 %vm409_vm1, %v5111_v46  ;;  %4175 = vmatprep.mubr.msk.f32.mxu0 %vm409_vm1, %v5137_v60  ;;  %6157 = vst [vmem:[#allocation27_spill] sm:$0xff] %v5163_v28  ;;  %v5173_v46 = vld [vmem:[%s4818_s6 + $0x168] sm:$0xff]  ;;  %6158 = vst [vmem:[#allocation28_spill] sm:$0xff] %v5185_v10 }
  0x43   : > { %v402_v45 = vrot.slane %v5173_v46, 1 }
  0x45   : > { %3976 = vmatmul.mubr.msk.f32.gmra.mrb[22].mxu1 %vm409_vm1, %v5133_v63  ;;  %4176 = vmatmul.mubr.msk.f32.gmra.mrb[22].mxu0 %vm409_vm1, %v5159_v38  ;;  %v5189_v63 = vsel %vm326_vm0, %v397_v59, %v398_v53  ;;  %v5211_v59 = vsel %vm326_vm0, %v398_v53, %v400_v8  ;;  %v5215_v39 = vsel %vm326_vm0, %v402_v45, %v403_v43  ;;  %v1661_v53 = vrot.slane %v5220_v11, 1 }
  0x46   : > { %3978 = vmatprep.mubr.msk.f32.mxu1 %vm409_vm1, %v5137_v60  ;;  %4178 = vmatprep.mubr.msk.f32.mxu0 %vm409_vm1, %v5163_v28  ;;  %6159 = vst [vmem:[#allocation29_spill] sm:$0xff] %v5189_v63  ;;  %v5199_v60 = vld [vmem:[%s4818_s6 + $0x180] sm:$0xff]  ;;  %6162 = vst [vmem:[#allocation32_spill] sm:$0xff] %v5211_v59  ;;  %v5231_v45 = vsel %vm326_vm0, %v403_v43, %v405_v7  ;;  %v997_v43 = vrot.slane %v4841_v14, 2 }
  0x47   : > { %6160 = vst [vmem:[#allocation30_spill] sm:$0xff] %v5199_v60  ;;  %6163 = vst [vmem:[#allocation33_spill] sm:$0xff] %v5215_v39 }
  0x48   : > { %6164 = vst [vmem:[#allocation34_spill] sm:$0xff] %v5231_v45 }
  0x49   : > { %3979 = vmatmul.mubr.msk.f32.gmra.mrb[24].mxu1 %vm409_vm1, %v5159_v38  ;;  %4179 = vmatmul.mubr.msk.f32.gmra.mrb[24].mxu0 %vm409_vm1, %v5185_v10  ;;  %v1658_v38 = vrot.slane %v5199_v60, 1 }
  0x4a   : > { %3981 = vmatprep.mubr.msk.f32.mxu1 %vm409_vm1, %v5163_v28  ;;  %4181 = vmatprep.mubr.msk.f32.mxu0 %vm409_vm1, %v5189_v63  ;;  %v994_v28 = vrot.slane %v4827_v6, 2 }
  0x4b   : > { %v5235_v8 = vsel %vm326_vm0, %v1658_v38, %v1659_v34  ;;  %v5249_v38 = vsel %vm326_vm0, %v1659_v34, %v1661_v53  ;;  %v1002_v34 = vrot.slane %v4853_v20, 2  ;;  %v1004_v53 = vrot.slane %v4861_v25, 2  ;;  %v5287_v20 = vld [vmem:[%s6069_s1 + $0x18] sm:$0xff] }
  0x4c   : > { %6165 = vst [vmem:[#allocation35_spill] sm:$0xff] %v5235_v8  ;;  %6166 = vst [vmem:[#allocation36_spill] sm:$0xff] %v5249_v38 }
  0x4d   : > { %3982 = vmatmul.mubr.msk.f32.gmra.mrb[26].mxu1 %vm409_vm1, %v5185_v10  ;;  %4182 = vmatmul.mubr.msk.f32.gmra.mrb[26].mxu0 %vm409_vm1, %v5211_v59  ;;  %v995_v10 = vrot.slane %v4832_v9, 2 }
  0x4e   : > { %3984 = vmatprep.mubr.msk.f32.mxu1 %vm409_vm1, %v5189_v63  ;;  %4184 = vmatprep.mubr.msk.f32.mxu0 %vm409_vm1, %v5215_v39  ;;  %v1000_v63 = vrot.slane %v4849_v18, 2 }
  0x4f   : > { %v5252_v7 = vsel %vm988_vm2, %v994_v28, %v995_v10  ;;  %v5265_v14 = vsel %vm988_vm2, %v995_v10, %v997_v43 }
  0x50   : > { %v5292_v10 = vsel %vm988_vm2, %v1000_v63, %v1002_v34  ;;  %v1015_v34 = vrot.slane %v4910_v42, 2 }
  0x51   : > { %3985 = vmatmul.mubr.msk.f32.gmra.mrb[28].mxu1 %vm409_vm1, %v5211_v59  ;;  %4185 = vmatmul.mubr.msk.f32.gmra.mrb[28].mxu0 %vm409_vm1, %v5231_v45  ;;  %v999_v59 = vrot.slane %v4844_v15, 2 }
  0x52   : > { %3987 = vmatprep.mubr.msk.f32.mxu1 %vm409_vm1, %v5215_v39  ;;  %4187 = vmatprep.mubr.msk.f32.mxu0 %vm409_vm1, %v5235_v8  ;;  %v1005_v8 = vrot.slane %v4864_v26, 2  ;;  %v1010_v39 = vrot.slane %v4878_v32, 2 }
  0x53   : > { %v5269_v28 = vsel %vm988_vm2, %v999_v59, %v1000_v63  ;;  %v1007_v59 = vrot.slane %v4867_v27, 2  ;;  %v1014_v63 = vrot.slane %v4907_v41, 2 }
  0x54   : > { %v5297_v43 = vsel %vm988_vm2, %v1004_v53, %v1005_v8  ;;  %v1019_v53 = vrot.slane %v4933_v49, 2 }
  0x55   : > { %3988 = vmatmul.mubr.msk.f32.gmra.mrb[30].mxu1 %vm409_vm1, %v5231_v45  ;;  %4188 = vmatmul.mubr.msk.f32.gmra.mrb[30].mxu0 %vm409_vm1, %v5249_v38  ;;  %v5278_v38 = vld [vmem:[%s6069_s1 + $0x38] sm:$0xff]  ;;  %v1009_v45 = vrot.slane %v4875_v31, 2  ;;  %v5313_v27 = vsel %vm988_vm2, %v1005_v8, %v1007_v59  ;;  %v5334_v8 = vsel %vm988_vm2, %v1014_v63, %v1015_v34  ;;  %v1020_v59 = vrot.slane %v4936_v50, 2 }
  0x56   : > { %3992 = vmatprep.mubr.msk.f32.mxu1 %vm409_vm1, %v4821_v4  ;;  %4192 = vmatprep.mubr.msk.f32.mxu0 %vm409_vm1, %v5252_v7  ;;  %v1024_v63 = vrot.slane %v4959_v57, 2 }
  0x59   : > { %3993 = vmatmul.mubr.msk.f32.vlgmr.msra.gmra.mrb[0].mxu1 %vm409_vm1, %v4824_v5  ;;  %4193 = vmatmul.mubr.msk.f32.vlgmr.msra.gmra.mrb[0].mxu0 %vm409_vm1, %v5265_v14 }
  0x5a   : > { %3995 = vmatprep.mubr.msk.f32.mxu1 %vm409_vm1, %v4827_v6  ;;  %4195 = vmatprep.mubr.msk.f32.mxu0 %vm409_vm1, %v5269_v28  ;;  %v1030_v6 = vrot.slane %v4994_v3, 2 }
  0x5b   : > { %4241 = vmatpush3.msra.mxu0 %v4883_v33  ;;  %4041 = vmatpush3.msra.mxu1 %v4977_v61  ;;  %v1012_v33 = vrot.slane %v4902_v40, 2  ;;  %v5317_v61 = vsel %vm988_vm2, %v1009_v45, %v1010_v39  ;;  %v1017_v45 = vrot.slane %v4928_v48, 2 }
  0x5c   : > { %4290 = vmatprep.subr.mxu0 %v5278_v38  ;;  %4090 = vmatprep.subr.mxu1 %v5287_v20 }
  0x5d   : > { %3996 = vmatmul.mubr.msk.f32.gmra.mrb[2].mxu1 %vm409_vm1, %v4832_v9  ;;  %4196 = vmatmul.mubr.msk.f32.gmra.mrb[2].mxu0 %vm409_vm1, %v5292_v10  ;;  %v5330_v40 = vsel %vm988_vm2, %v1010_v39, %v1012_v33  ;;  %v5347_v48 = vsel %vm988_vm2, %v1015_v34, %v1017_v45  ;;  %v1022_v39 = vrot.slane %v4954_v56, 2  ;;  %v5351_v33 = vsel %vm988_vm2, %v1019_v53, %v1020_v59 }
  0x5e   : > { %3998 = vmatprep.mubr.msk.f32.mxu1 %vm409_vm1, %v4844_v15  ;;  %4198 = vmatprep.mubr.msk.f32.mxu0 %vm409_vm1, %v5297_v43  ;;  %6167 = vst [vmem:[#allocation37_spill] sm:$0xff] %v5351_v33  ;;  %v1025_v9 = vrot.slane %v4962_v58, 2  ;;  %v1027_v34 = vrot.slane %v4985_v1, 2  ;;  %v1029_v53 = vrot.slane %v4991_v2, 2 }
  0x5f   : > { %v5364_v56 = vsel %vm988_vm2, %v1020_v59, %v1022_v39  ;;  %v1032_v59 = vrot.slane %v5012_v16, 2  ;;  %v1037_v16 = vrot.slane %v5038_v29, 2  ;;  %v1042_v29 = vrot.slane %v5064_v52, 2 }
  0x60   : > { %v5368_v45 = vsel %vm988_vm2, %v1024_v63, %v1025_v9  ;;  %v5381_v1 = vsel %vm988_vm2, %v1025_v9, %v1027_v34  ;;  %v5385_v39 = vsel %vm988_vm2, %v1029_v53, %v1030_v6  ;;  %v1034_v63 = vrot.slane %v5017_v17, 2 }
  0x61   : > { %3999 = vmatmul.mubr.msk.f32.gmra.mrb[4].mxu1 %vm409_vm1, %v4849_v18  ;;  %4199 = vmatmul.mubr.msk.f32.gmra.mrb[4].mxu0 %vm409_vm1, %v5313_v27  ;;  %6168 = vst [vmem:[#allocation38_spill] sm:$0xff] %v5368_v45  ;;  %6169 = vst [vmem:[#allocation39_spill] sm:$0xff] %v5385_v39  ;;  %v5398_v9 = vsel %vm988_vm2, %v1030_v6, %v1032_v59  ;;  %v1039_v53 = vrot.slane %v5043_v30, 2 }
  0x62   : > { %4001 = vmatprep.mubr.msk.f32.mxu1 %vm409_vm1, %v4861_v25  ;;  %4201 = vmatprep.mubr.msk.f32.mxu0 %vm409_vm1, %v5317_v61 }
  0x65   : > { %4002 = vmatmul.mubr.msk.f32.gmra.mrb[6].mxu1 %vm409_vm1, %v4864_v26  ;;  %4202 = vmatmul.mubr.msk.f32.gmra.mrb[6].mxu0 %vm409_vm1, %v5330_v40 }
  0x66   : > { %4004 = vmatprep.mubr.msk.f32.mxu1 %vm409_vm1, %v4875_v31  ;;  %4204 = vmatprep.mubr.msk.f32.mxu0 %vm409_vm1, %v5334_v8 }
  0x69   : > { %4005 = vmatmul.mubr.msk.f32.gmra.mrb[8].mxu1 %vm409_vm1, %v4878_v32  ;;  %4205 = vmatmul.mubr.msk.f32.gmra.mrb[8].mxu0 %vm409_vm1, %v5347_v48 }
  0x6a   : > { %4007 = vmatprep.mubr.msk.f32.mxu1 %vm409_vm1, %v4907_v41  ;;  %4207 = vmatprep.mubr.msk.f32.mxu0 %vm409_vm1, %v5351_v33  ;;  %v1035_v33 = vrot.slane %v5020_v19, 2 }
  0x6c   : > { %v5402_v34 = vsel %vm988_vm2, %v1034_v63, %v1035_v33  ;;  %v5415_v6 = vsel %vm988_vm2, %v1035_v33, %v1037_v16  ;;  %v1044_v63 = vrot.slane %v5069_v54, 2  ;;  %v1047_v33 = vrot.slane %v5090_v13, 2 }
  0x6d   : > { %4008 = vmatmul.mubr.msk.f32.gmra.mrb[10].mxu1 %vm409_vm1, %v4910_v42  ;;  %4208 = vmatmul.mubr.msk.f32.gmra.mrb[10].mxu0 %vm409_vm1, %v5364_v56  ;;  %6170 = vst [vmem:[#allocation40_spill] sm:$0xff] %v5402_v34 }
  0x6e   : > { %4010 = vmatprep.mubr.msk.f32.mxu1 %vm409_vm1, %v4933_v49  ;;  %4210 = vmatprep.mubr.msk.f32.mxu0 %vm409_vm1, %v5368_v45  ;;  %v1040_v45 = vrot.slane %v5046_v36, 2 }
  0x70   : > { %v5419_v59 = vsel %vm988_vm2, %v1039_v53, %v1040_v45  ;;  %v5432_v52 = vsel %vm988_vm2, %v1040_v45, %v1042_v29  ;;  %v1049_v53 = vrot.slane %v5095_v22, 2  ;;  %v1052_v45 = vrot.slane %v5116_v21, 2 }
  0x71   : > { %4011 = vmatmul.mubr.msk.f32.gmra.mrb[12].mxu1 %vm409_vm1, %v4936_v50  ;;  %4211 = vmatmul.mubr.msk.f32.gmra.mrb[12].mxu0 %vm409_vm1, %v5381_v1  ;;  %6171 = vst [vmem:[#allocation41_spill] sm:$0xff] %v5419_v59 }
  0x72   : > { %4013 = vmatprep.mubr.msk.f32.mxu1 %vm409_vm1, %v4959_v57  ;;  %4213 = vmatprep.mubr.msk.f32.mxu0 %vm409_vm1, %v5385_v39  ;;  %v1045_v39 = vrot.slane %v5072_v55, 2 }
  0x74   : > { %v5436_v16 = vsel %vm988_vm2, %v1044_v63, %v1045_v39  ;;  %v5449_v13 = vsel %vm988_vm2, %v1045_v39, %v1047_v33  ;;  %v1054_v63 = vrot.slane %v5121_v44, 2  ;;  %v1057_v39 = vrot.slane %v5142_v62, 2 }
  0x75   : > { %4014 = vmatmul.mubr.msk.f32.gmra.mrb[14].mxu1 %vm409_vm1, %v4962_v58  ;;  %4214 = vmatmul.mubr.msk.f32.gmra.mrb[14].mxu0 %vm409_vm1, %v5398_v9  ;;  %6172 = vst [vmem:[#allocation42_spill] sm:$0xff] %v5436_v16 }
  0x76   : > { %4016 = vmatprep.mubr.msk.f32.mxu1 %vm409_vm1, %v4991_v2  ;;  %4216 = vmatprep.mubr.msk.f32.mxu0 %vm409_vm1, %v5402_v34  ;;  %v1050_v34 = vrot.slane %v5098_v24, 2 }
  0x78   : > { %v5453_v29 = vsel %vm988_vm2, %v1049_v53, %v1050_v34  ;;  %v5466_v21 = vsel %vm988_vm2, %v1050_v34, %v1052_v45  ;;  %v1059_v53 = vrot.slane %v5147_v0, 2  ;;  %v1062_v34 = vrot.slane %v5168_v51, 2 }
  0x79   : > { %4017 = vmatmul.mubr.msk.f32.gmra.mrb[16].mxu1 %vm409_vm1, %v4994_v3  ;;  %4217 = vmatmul.mubr.msk.f32.gmra.mrb[16].mxu0 %vm409_vm1, %v5415_v6  ;;  %6173 = vst [vmem:[#allocation43_spill] sm:$0xff] %v5453_v29 }
  0x7a   : > { %4019 = vmatprep.mubr.msk.f32.mxu1 %vm409_vm1, %v5017_v17  ;;  %4219 = vmatprep.mubr.msk.f32.mxu0 %vm409_vm1, %v5419_v59  ;;  %v1055_v59 = vrot.slane %v5124_v47, 2 }
  0x7c   : > { %v5470_v33 = vsel %vm988_vm2, %v1054_v63, %v1055_v59  ;;  %v5483_v62 = vsel %vm988_vm2, %v1055_v59, %v1057_v39  ;;  %v1064_v63 = vrot.slane %v5173_v46, 2  ;;  %v1067_v59 = vrot.slane %v5194_v37, 2 }
  0x7d   : > { %4020 = vmatmul.mubr.msk.f32.gmra.mrb[18].mxu1 %vm409_vm1, %v5020_v19  ;;  %4220 = vmatmul.mubr.msk.f32.gmra.mrb[18].mxu0 %vm409_vm1, %v5432_v52  ;;  %6174 = vst [vmem:[#allocation44_spill] sm:$0xff] %v5470_v33 }
  0x7e   : > { %4022 = vmatprep.mubr.msk.f32.mxu1 %vm409_vm1, %v5043_v30  ;;  %4222 = vmatprep.mubr.msk.f32.mxu0 %vm409_vm1, %v5436_v16  ;;  %v1060_v16 = vrot.slane %v5150_v12, 2 }
  0x80   : > { %v5487_v45 = vsel %vm988_vm2, %v1059_v53, %v1060_v16  ;;  %v5500_v51 = vsel %vm988_vm2, %v1060_v16, %v1062_v34  ;;  %v1926_v53 = vrot.slane %v5199_v60, 2  ;;  %v1929_v16 = vrot.slane %v5220_v11, 2 }
  0x81   : > { %4023 = vmatmul.mubr.msk.f32.gmra.mrb[20].mxu1 %vm409_vm1, %v5046_v36  ;;  %4223 = vmatmul.mubr.msk.f32.gmra.mrb[20].mxu0 %vm409_vm1, %v5449_v13  ;;  %6175 = vst [vmem:[#allocation45_spill] sm:$0xff] %v5500_v51  ;;  %v989_v34 = vrot.slane %v4821_v4, 2 }
  0x82   : > { %4025 = vmatprep.mubr.msk.f32.mxu1 %vm409_vm1, %v5069_v54  ;;  %4225 = vmatprep.mubr.msk.f32.mxu0 %vm409_vm1, %v5453_v29  ;;  %v1065_v29 = vrot.slane %v5176_v23, 2 }
  0x84   : > { %v5504_v39 = vsel %vm988_vm2, %v1064_v63, %v1065_v29  ;;  %v5517_v37 = vsel %vm988_vm2, %v1065_v29, %v1067_v59  ;;  %v990_v63 = vrot.slane %v4824_v5, 2  ;;  %v5550_v29 = vld [vmem:[%s6069_s1 + $0x40] sm:$0xff]  ;;  %v6187_v59 = vld [vmem:[#allocation44_spill] sm:$0xff] }
  0x85   : > { %4026 = vmatmul.mubr.msk.f32.gmra.mrb[22].mxu1 %vm409_vm1, %v5072_v55  ;;  %4226 = vmatmul.mubr.msk.f32.gmra.mrb[22].mxu0 %vm409_vm1, %v5466_v21  ;;  %6176 = vst [vmem:[#allocation46_spill] sm:$0xff] %v5504_v39 }
  0x86   : > { %4028 = vmatprep.mubr.msk.f32.mxu1 %vm409_vm1, %v5095_v22  ;;  %4228 = vmatprep.mubr.msk.f32.mxu0 %vm409_vm1, %v5470_v33  ;;  %v1927_v33 = vrot.slane %v5202_v35, 2  ;;  %v991_v5 = vsel %vm988_vm2, %v989_v34, %v990_v63 }
  0x88   : > { %v5523_v35 = vsel %vm988_vm2, %v1926_v53, %v1927_v33  ;;  %v5535_v4 = vsel %vm988_vm2, %v1927_v33, %v1929_v16  ;;  %v6185_v33 = vld [vmem:[#allocation42_spill] sm:$0xff]  ;;  %v5666_v16 = vld [vmem:[%s4818_s6 + $0x198] sm:$0xff] }
  0x89   : > { %4029 = vmatmul.mubr.msk.f32.gmra.mrb[24].mxu1 %vm409_vm1, %v5098_v24  ;;  %4229 = vmatmul.mubr.msk.f32.gmra.mrb[24].mxu0 %vm409_vm1, %v5483_v62  ;;  %6177 = vst [vmem:[#allocation47_spill] sm:$0xff] %v5523_v35  ;;  %v6188_v53 = vld [vmem:[#allocation30_spill] sm:$0xff]  ;;  %v6189_v34 = vld [vmem:[#allocation45_spill] sm:$0xff] }
  0x8a   : > { %4031 = vmatprep.mubr.msk.f32.mxu1 %vm409_vm1, %v5121_v44  ;;  %4231 = vmatprep.mubr.msk.f32.mxu0 %vm409_vm1, %v5487_v45 }
  0x8d   : > { %4032 = vmatmul.mubr.msk.f32.gmra.mrb[26].mxu1 %vm409_vm1, %v5124_v47  ;;  %4232 = vmatmul.mubr.msk.f32.gmra.mrb[26].mxu0 %vm409_vm1, %v5500_v51  ;;  %v6178_v51 = vld [vmem:[#allocation4_spill] sm:$0xff] }
  0x8e   : > { %4034 = vmatprep.mubr.msk.f32.mxu1 %vm409_vm1, %v5147_v0  ;;  %4234 = vmatprep.mubr.msk.f32.mxu0 %vm409_vm1, %v5504_v39  ;;  %v992_v60 = vrot.slane %v6178_v51, 2  ;;  %6179 = vst [vmem:[#allocation4_spill] sm:$0xff] %v5535_v4  ;;  %v6186_v51 = vld [vmem:[#allocation43_spill] sm:$0xff] }
  0x90   : > { %v993_v11 = vsel %vm988_vm2, %v990_v63, %v992_v60  ;;  %v6180_v60 = vld [vmem:[#allocation37_spill] sm:$0xff]  ;;  %v6190_v63 = vld [vmem:[#allocation31_spill] sm:$0xff] }
  0x91   : > { %4035 = vmatmul.mubr.msk.f32.gmra.mrb[28].mxu1 %vm409_vm1, %v5150_v12  ;;  %4235 = vmatmul.mubr.msk.f32.gmra.mrb[28].mxu0 %vm409_vm1, %v5517_v37 }
  0x92   : > { %4037 = vmatprep.mubr.msk.f32.mxu1 %vm409_vm1, %v5173_v46  ;;  %4237 = vmatprep.mubr.msk.f32.mxu0 %vm409_vm1, %v5523_v35  ;;  %v6193_v35 = vld [vmem:[#allocation3_spill] sm:$0xff] }
  0x95   : > { %4038 = vmatmul.mubr.msk.f32.gmra.mrb[30].mxu1 %vm409_vm1, %v5176_v23  ;;  %4238 = vmatmul.mubr.msk.f32.gmra.mrb[30].mxu0 %vm409_vm1, %v5535_v4  ;;  %v6192_v4 = vld [vmem:[#allocation5_spill] sm:$0xff] }
  0x96   : > { %4042 = vmatprep.mubr.msk.f32.mxu1 %vm409_vm1, %v991_v5  ;;  %4242 = vmatprep.mubr.msk.f32.mxu0 %vm409_vm1, %v4844_v15  ;;  %v5677_v5 = vld [vmem:[%s4818_s6 + $0x1a0] sm:$0xff] }
  0x99   : > { %4043 = vmatmul.mubr.msk.f32.vlgmr.msra.gmra.mrb[0].mxu1 %vm409_vm1, %v993_v11  ;;  %4243 = vmatmul.mubr.msk.f32.vlgmr.msra.gmra.mrb[0].mxu0 %vm409_vm1, %v4849_v18  ;;  %v6191_v11 = vld [vmem:[#allocation2_spill] sm:$0xff] }
  0x9a   : > { %4045 = vmatprep.mubr.msk.f32.mxu1 %vm409_vm1, %v5252_v7  ;;  %4245 = vmatprep.mubr.msk.f32.mxu0 %vm409_vm1, %v4861_v25  ;;  %v6182_v7 = vld [vmem:[#allocation39_spill] sm:$0xff] }
  0x9b   : > { %4291 = vmatpush3.msra.mxu0 %v5278_v38  ;;  %4091 = vmatpush3.msra.mxu1 %v5287_v20  ;;  %v6181_v38 = vld [vmem:[#allocation38_spill] sm:$0xff]  ;;  %v6184_v20 = vld [vmem:[#allocation41_spill] sm:$0xff] }
  0x9c   : > { %4340 = vmatprep.subr.mxu0 %v5550_v29 }
  0x9d   : > { %4046 = vmatmul.mubr.msk.f32.gmra.mrb[2].mxu1 %vm409_vm1, %v5265_v14  ;;  %4246 = vmatmul.mubr.msk.f32.gmra.mrb[2].mxu0 %vm409_vm1, %v4864_v26  ;;  %v6183_v14 = vld [vmem:[#allocation40_spill] sm:$0xff] }
  0x9e   : > { %4048 = vmatprep.mubr.msk.f32.mxu1 %vm409_vm1, %v5269_v28  ;;  %4248 = vmatprep.mubr.msk.f32.mxu0 %vm409_vm1, %v4875_v31 }
  0xa1   : > { %4049 = vmatmul.mubr.msk.f32.gmra.mrb[4].mxu1 %vm409_vm1, %v5292_v10  ;;  %4249 = vmatmul.mubr.msk.f32.gmra.mrb[4].mxu0 %vm409_vm1, %v4878_v32 }
  0xa2   : > { %4051 = vmatprep.mubr.msk.f32.mxu1 %vm409_vm1, %v5297_v43  ;;  %4251 = vmatprep.mubr.msk.f32.mxu0 %vm409_vm1, %v4907_v41 }
  0xa5   : > { %4052 = vmatmul.mubr.msk.f32.gmra.mrb[6].mxu1 %vm409_vm1, %v5313_v27  ;;  %4252 = vmatmul.mubr.msk.f32.gmra.mrb[6].mxu0 %vm409_vm1, %v4910_v42 }
  0xa6   : > { %4054 = vmatprep.mubr.msk.f32.mxu1 %vm409_vm1, %v5317_v61  ;;  %4254 = vmatprep.mubr.msk.f32.mxu0 %vm409_vm1, %v4933_v49 }
  0xa9   : > { %4055 = vmatmul.mubr.msk.f32.gmra.mrb[8].mxu1 %vm409_vm1, %v5330_v40  ;;  %4255 = vmatmul.mubr.msk.f32.gmra.mrb[8].mxu0 %vm409_vm1, %v4936_v50 }
  0xaa   : > { %4057 = vmatprep.mubr.msk.f32.mxu1 %vm409_vm1, %v5334_v8  ;;  %4257 = vmatprep.mubr.msk.f32.mxu0 %vm409_vm1, %v4959_v57 }
  0xad   : > { %4058 = vmatmul.mubr.msk.f32.gmra.mrb[10].mxu1 %vm409_vm1, %v5347_v48  ;;  %4258 = vmatmul.mubr.msk.f32.gmra.mrb[10].mxu0 %vm409_vm1, %v4962_v58 }
  0xae   : > { %4060 = vmatprep.mubr.msk.f32.mxu1 %vm409_vm1, %v6180_v60  ;;  %4260 = vmatprep.mubr.msk.f32.mxu0 %vm409_vm1, %v4991_v2 }
  0xb1   : > { %4061 = vmatmul.mubr.msk.f32.gmra.mrb[12].mxu1 %vm409_vm1, %v5364_v56  ;;  %4261 = vmatmul.mubr.msk.f32.gmra.mrb[12].mxu0 %vm409_vm1, %v4994_v3 }
  0xb2   : > { %4063 = vmatprep.mubr.msk.f32.mxu1 %vm409_vm1, %v6181_v38  ;;  %4263 = vmatprep.mubr.msk.f32.mxu0 %vm409_vm1, %v5017_v17 }
  0xb5   : > { %4064 = vmatmul.mubr.msk.f32.gmra.mrb[14].mxu1 %vm409_vm1, %v5381_v1  ;;  %4264 = vmatmul.mubr.msk.f32.gmra.mrb[14].mxu0 %vm409_vm1, %v5020_v19 }
  0xb6   : > { %4066 = vmatprep.mubr.msk.f32.mxu1 %vm409_vm1, %v6182_v7  ;;  %4266 = vmatprep.mubr.msk.f32.mxu0 %vm409_vm1, %v5043_v30 }
  0xb9   : > { %4067 = vmatmul.mubr.msk.f32.gmra.mrb[16].mxu1 %vm409_vm1, %v5398_v9  ;;  %4267 = vmatmul.mubr.msk.f32.gmra.mrb[16].mxu0 %vm409_vm1, %v5046_v36 }
  0xba   : > { %4069 = vmatprep.mubr.msk.f32.mxu1 %vm409_vm1, %v6183_v14  ;;  %4269 = vmatprep.mubr.msk.f32.mxu0 %vm409_vm1, %v5069_v54 }
  0xbd   : > { %4070 = vmatmul.mubr.msk.f32.gmra.mrb[18].mxu1 %vm409_vm1, %v5415_v6  ;;  %4270 = vmatmul.mubr.msk.f32.gmra.mrb[18].mxu0 %vm409_vm1, %v5072_v55 }
  0xbe   : > { %4072 = vmatprep.mubr.msk.f32.mxu1 %vm409_vm1, %v6184_v20  ;;  %4272 = vmatprep.mubr.msk.f32.mxu0 %vm409_vm1, %v5095_v22 }
  0xc1   : > { %4073 = vmatmul.mubr.msk.f32.gmra.mrb[20].mxu1 %vm409_vm1, %v5432_v52  ;;  %4273 = vmatmul.mubr.msk.f32.gmra.mrb[20].mxu0 %vm409_vm1, %v5098_v24 }
  0xc2   : > { %4075 = vmatprep.mubr.msk.f32.mxu1 %vm409_vm1, %v6185_v33  ;;  %4275 = vmatprep.mubr.msk.f32.mxu0 %vm409_vm1, %v5121_v44 }
  0xc5   : > { %4076 = vmatmul.mubr.msk.f32.gmra.mrb[22].mxu1 %vm409_vm1, %v5449_v13  ;;  %4276 = vmatmul.mubr.msk.f32.gmra.mrb[22].mxu0 %vm409_vm1, %v5124_v47 }
  0xc6   : > { %4078 = vmatprep.mubr.msk.f32.mxu1 %vm409_vm1, %v6186_v51  ;;  %4278 = vmatprep.mubr.msk.f32.mxu0 %vm409_vm1, %v5147_v0 }
  0xc9   : > { %4079 = vmatmul.mubr.msk.f32.gmra.mrb[24].mxu1 %vm409_vm1, %v5466_v21  ;;  %4279 = vmatmul.mubr.msk.f32.gmra.mrb[24].mxu0 %vm409_vm1, %v5150_v12 }
  0xca   : > { %4081 = vmatprep.mubr.msk.f32.mxu1 %vm409_vm1, %v6187_v59  ;;  %4281 = vmatprep.mubr.msk.f32.mxu0 %vm409_vm1, %v5173_v46 }
  0xcd   : > { %4082 = vmatmul.mubr.msk.f32.gmra.mrb[26].mxu1 %vm409_vm1, %v5483_v62  ;;  %4282 = vmatmul.mubr.msk.f32.gmra.mrb[26].mxu0 %vm409_vm1, %v5176_v23 }
  0xce   : > { %4084 = vmatprep.mubr.msk.f32.mxu1 %vm409_vm1, %v5487_v45  ;;  %4284 = vmatprep.mubr.msk.f32.mxu0 %vm409_vm1, %v6188_v53 }
  0xd1   : > { %4085 = vmatmul.mubr.msk.f32.gmra.mrb[28].mxu1 %vm409_vm1, %v6189_v34  ;;  %4285 = vmatmul.mubr.msk.f32.gmra.mrb[28].mxu0 %vm409_vm1, %v6190_v63  ;;  %v6195_v34 = vld [vmem:[#allocation7_spill] sm:$0xff] }
  0xd2   : > { %4087 = vmatprep.mubr.msk.f32.mxu1 %vm409_vm1, %v5504_v39  ;;  %4287 = vmatprep.mubr.msk.f32.mxu0 %vm409_vm1, %v5666_v16  ;;  %v6194_v39 = vld [vmem:[#allocation6_spill] sm:$0xff] }
  0xd5   : > { %4088 = vmatmul.mubr.msk.f32.gmra.mrb[30].mxu1 %vm409_vm1, %v5517_v37  ;;  %4288 = vmatmul.mubr.msk.f32.gmra.mrb[30].mxu0 %vm409_vm1, %v5677_v5 }
  0xd6   : > { %4092 = vmatprep.mubr.msk.f32.mxu1 %vm409_vm1, %v6191_v11  ;;  %4292 = vmatprep.mubr.msk.f32.mxu0 %vm409_vm1, %v6192_v4  ;;  %v6196_v11 = vld [vmem:[#allocation8_spill] sm:$0xff]  ;;  %v2461_v4 = vrot.slane %v5677_v5, 1 }
  0xd9   : > { %4093 = vmatmul.mubr.msk.f32.vlgmr.msra.gmra.mrb[0].mxu1 %vm409_vm1, %v6193_v35  ;;  %4293 = vmatmul.mubr.msk.f32.vlgmr.msra.gmra.mrb[0].mxu0 %vm409_vm1, %v6194_v39  ;;  %v6197_v35 = vld [vmem:[#allocation9_spill] sm:$0xff]  ;;  %v6199_v39 = vld [vmem:[#allocation11_spill] sm:$0xff] }
  0xda   : > { %4095 = vmatprep.mubr.msk.f32.mxu1 %vm409_vm1, %v4844_v15  ;;  %4295 = vmatprep.mubr.msk.f32.mxu0 %vm409_vm1, %v6195_v34  ;;  %v6198_v15 = vld [vmem:[#allocation10_spill] sm:$0xff] }
  0xdb   : > { %4341 = vmatpush3.msra.mxu0 %v5550_v29  ;;  %v6220_v29 = vld [vmem:[#allocation34_spill] sm:$0xff] }
  0xdd   : > { %4096 = vmatmul.mubr.msk.f32.gmra.mrb[2].mxu1 %vm409_vm1, %v4849_v18  ;;  %4296 = vmatmul.mubr.msk.f32.gmra.mrb[2].mxu0 %vm409_vm1, %v6196_v11  ;;  %v6200_v18 = vld [vmem:[#allocation12_spill] sm:$0xff] }
  0xde   : > { %4098 = vmatprep.mubr.msk.f32.mxu1 %vm409_vm1, %v4861_v25  ;;  %4298 = vmatprep.mubr.msk.f32.mxu0 %vm409_vm1, %v6197_v35  ;;  %v6201_v25 = vld [vmem:[#allocation13_spill] sm:$0xff]  ;;  %v6222_v11 = vld [vmem:[#allocation36_spill] sm:$0xff] }
  0xe1   : > { %4099 = vmatmul.mubr.msk.f32.gmra.mrb[4].mxu1 %vm409_vm1, %v4864_v26  ;;  %4299 = vmatmul.mubr.msk.f32.gmra.mrb[4].mxu0 %vm409_vm1, %v6198_v15  ;;  %v6202_v26 = vld [vmem:[#allocation14_spill] sm:$0xff] }
  0xe2   : > { %4101 = vmatprep.mubr.msk.f32.mxu1 %vm409_vm1, %v4875_v31  ;;  %4301 = vmatprep.mubr.msk.f32.mxu0 %vm409_vm1, %v6199_v39  ;;  %v6203_v31 = vld [vmem:[#allocation15_spill] sm:$0xff] }
  0xe5   : > { %4102 = vmatmul.mubr.msk.f32.gmra.mrb[6].mxu1 %vm409_vm1, %v4878_v32  ;;  %4302 = vmatmul.mubr.msk.f32.gmra.mrb[6].mxu0 %vm409_vm1, %v6200_v18  ;;  %v6204_v32 = vld [vmem:[#allocation16_spill] sm:$0xff] }
  0xe6   : > { %4104 = vmatprep.mubr.msk.f32.mxu1 %vm409_vm1, %v4907_v41  ;;  %4304 = vmatprep.mubr.msk.f32.mxu0 %vm409_vm1, %v6201_v25  ;;  %v6205_v41 = vld [vmem:[#allocation17_spill] sm:$0xff] }
  0xe9   : > { %4105 = vmatmul.mubr.msk.f32.gmra.mrb[8].mxu1 %vm409_vm1, %v4910_v42  ;;  %4305 = vmatmul.mubr.msk.f32.gmra.mrb[8].mxu0 %vm409_vm1, %v6202_v26  ;;  %v6206_v42 = vld [vmem:[#allocation18_spill] sm:$0xff] }
  0xea   : > { %4107 = vmatprep.mubr.msk.f32.mxu1 %vm409_vm1, %v4933_v49  ;;  %4307 = vmatprep.mubr.msk.f32.mxu0 %vm409_vm1, %v6203_v31  ;;  %v6207_v49 = vld [vmem:[#allocation19_spill] sm:$0xff] }
  0xed   : > { %4108 = vmatmul.mubr.msk.f32.gmra.mrb[10].mxu1 %vm409_vm1, %v4936_v50  ;;  %4308 = vmatmul.mubr.msk.f32.gmra.mrb[10].mxu0 %vm409_vm1, %v6204_v32  ;;  %v6208_v50 = vld [vmem:[#allocation20_spill] sm:$0xff] }
  0xee   : > { %4110 = vmatprep.mubr.msk.f32.mxu1 %vm409_vm1, %v4959_v57  ;;  %4310 = vmatprep.mubr.msk.f32.mxu0 %vm409_vm1, %v6205_v41  ;;  %v6209_v57 = vld [vmem:[#allocation21_spill] sm:$0xff] }
  0xf1   : > { %4111 = vmatmul.mubr.msk.f32.gmra.mrb[12].mxu1 %vm409_vm1, %v4962_v58  ;;  %4311 = vmatmul.mubr.msk.f32.gmra.mrb[12].mxu0 %vm409_vm1, %v6206_v42  ;;  %v6210_v58 = vld [vmem:[#allocation22_spill] sm:$0xff] }
  0xf2   : > { %4113 = vmatprep.mubr.msk.f32.mxu1 %vm409_vm1, %v4991_v2  ;;  %4313 = vmatprep.mubr.msk.f32.mxu0 %vm409_vm1, %v6207_v49  ;;  %v6211_v2 = vld [vmem:[#allocation23_spill] sm:$0xff] }
  0xf5   : > { %4114 = vmatmul.mubr.msk.f32.gmra.mrb[14].mxu1 %vm409_vm1, %v4994_v3  ;;  %4314 = vmatmul.mubr.msk.f32.gmra.mrb[14].mxu0 %vm409_vm1, %v6208_v50  ;;  %v6212_v3 = vld [vmem:[#allocation24_spill] sm:$0xff]  ;;  %v5929_v50 = vld [vmem:[%s6070_s2] ss:$0 sm:$0xff] }
  0xf6   : > { %4116 = vmatprep.mubr.msk.f32.mxu1 %vm409_vm1, %v5017_v17  ;;  %4316 = vmatprep.mubr.msk.f32.mxu0 %vm409_vm1, %v6209_v57  ;;  %v6213_v17 = vld [vmem:[#allocation25_spill] sm:$0xff] }
  0xf9   : > { %4117 = vmatmul.mubr.msk.f32.gmra.mrb[16].mxu1 %vm409_vm1, %v5020_v19  ;;  %4317 = vmatmul.mubr.msk.f32.gmra.mrb[16].mxu0 %vm409_vm1, %v6210_v58  ;;  %v6214_v19 = vld [vmem:[#allocation26_spill] sm:$0xff] }
  0xfa   : > { %4119 = vmatprep.mubr.msk.f32.mxu1 %vm409_vm1, %v5043_v30  ;;  %4319 = vmatprep.mubr.msk.f32.mxu0 %vm409_vm1, %v6211_v2  ;;  %v6215_v30 = vld [vmem:[#allocation27_spill] sm:$0xff] }
  0xfd   : > { %4120 = vmatmul.mubr.msk.f32.gmra.mrb[18].mxu1 %vm409_vm1, %v5046_v36  ;;  %4320 = vmatmul.mubr.msk.f32.gmra.mrb[18].mxu0 %vm409_vm1, %v6212_v3  ;;  %v6216_v36 = vld [vmem:[#allocation28_spill] sm:$0xff] }
  0xfe   : > { %4122 = vmatprep.mubr.msk.f32.mxu1 %vm409_vm1, %v5069_v54  ;;  %4322 = vmatprep.mubr.msk.f32.mxu0 %vm409_vm1, %v6213_v17  ;;  %v6217_v54 = vld [vmem:[#allocation29_spill] sm:$0xff] }
 0x101   : > { %4123 = vmatmul.mubr.msk.f32.gmra.mrb[20].mxu1 %vm409_vm1, %v5072_v55  ;;  %4323 = vmatmul.mubr.msk.f32.gmra.mrb[20].mxu0 %vm409_vm1, %v6214_v19  ;;  %v6218_v55 = vld [vmem:[#allocation32_spill] sm:$0xff] }
 0x102   : > { %4125 = vmatprep.mubr.msk.f32.mxu1 %vm409_vm1, %v5095_v22  ;;  %4325 = vmatprep.mubr.msk.f32.mxu0 %vm409_vm1, %v6215_v30  ;;  %v6219_v22 = vld [vmem:[#allocation33_spill] sm:$0xff] }
 0x105   : > { %4126 = vmatmul.mubr.msk.f32.gmra.mrb[22].mxu1 %vm409_vm1, %v5098_v24  ;;  %4326 = vmatmul.mubr.msk.f32.gmra.mrb[22].mxu0 %vm409_vm1, %v6216_v36  ;;  %v2460_v24 = vrot.slane %v5666_v16, 1 }
 0x106   : > { %4128 = vmatprep.mubr.msk.f32.mxu1 %vm409_vm1, %v5121_v44  ;;  %4328 = vmatprep.mubr.msk.f32.mxu0 %vm409_vm1, %v6217_v54  ;;  %v276_v44 = vld [vmem:[%s4818_s6 + $0x1a8] sm:$0x3] }
 0x107   : > { %v2462_v34 = vsel %vm326_vm0, %v2460_v24, %v2461_v4 }
 0x109   : > { %4129 = vmatmul.mubr.msk.f32.gmra.mrb[24].mxu1 %vm409_vm1, %v5124_v47  ;;  %4329 = vmatmul.mubr.msk.f32.gmra.mrb[24].mxu0 %vm409_vm1, %v6218_v55  ;;  %v6221_v47 = vld [vmem:[#allocation35_spill] sm:$0xff] }
 0x10a   : > { %4131 = vmatprep.mubr.msk.f32.mxu1 %vm409_vm1, %v5147_v0  ;;  %4331 = vmatprep.mubr.msk.f32.mxu0 %vm409_vm1, %v6219_v22  ;;  %v2463_v0 = vrot.slane %v276_v44, 1 }
 0x10d   : > { %4132 = vmatmul.mubr.msk.f32.gmra.mrb[26].mxu1 %vm409_vm1, %v5150_v12  ;;  %4332 = vmatmul.mubr.msk.f32.gmra.mrb[26].mxu0 %vm409_vm1, %v6220_v29  ;;  %v2464_v12 = vsel %vm326_vm0, %v2461_v4, %v2463_v0 }
 0x10e   : > { %4134 = vmatprep.mubr.msk.f32.mxu1 %vm409_vm1, %v5173_v46  ;;  %4334 = vmatprep.mubr.msk.f32.mxu0 %vm409_vm1, %v6221_v47  ;;  %v6223_v46 = vld [vmem:[#allocation45_spill] sm:$0xff] }
 0x111   : > { %4135 = vmatmul.mubr.msk.f32.gmra.mrb[28].mxu1 %vm409_vm1, %v5176_v23  ;;  %4335 = vmatmul.mubr.msk.f32.gmra.mrb[28].mxu0 %vm409_vm1, %v6222_v11  ;;  %v6224_v23 = vld [vmem:[#allocation46_spill] sm:$0xff] }
 0x112   : > { %4137 = vmatprep.mubr.msk.f32.mxu1 %vm409_vm1, %v6188_v53  ;;  %4337 = vmatprep.mubr.msk.f32.mxu0 %vm409_vm1, %v2462_v34 }
 0x115   : > { %4138 = vmatmul.mubr.msk.f32.gmra.mrb[30].mxu1 %vm409_vm1, %v6190_v63  ;;  %4338 = vmatmul.mubr.msk.f32.gmra.mrb[30].mxu0 %vm409_vm1, %v2464_v12 }
 0x116   : > { %4342 = vmatprep.mubr.msk.f32.mxu0 %vm409_vm1, %v5269_v28  ;;  %v2728_v28 = vrot.slane %v5666_v16, 2 }
 0x119   : > { %4343 = vmatmul.mubr.msk.f32.vlgmr.msra.gmra.mrb[0].mxu0 %vm409_vm1, %v5292_v10  ;;  %v2729_v10 = vrot.slane %v5677_v5, 2 }
 0x11a   : > { %4345 = vmatprep.mubr.msk.f32.mxu0 %vm409_vm1, %v5297_v43  ;;  %v6225_v43 = vld [vmem:[#allocation47_spill] sm:$0xff] }
 0x11d   : > { %4346 = vmatmul.mubr.msk.f32.gmra.mrb[2].mxu0 %vm409_vm1, %v5313_v27  ;;  %v2731_v27 = vrot.slane %v276_v44, 2 }
 0x11e   : > { %4348 = vmatprep.mubr.msk.f32.mxu0 %vm409_vm1, %v5317_v61  ;;  %v2730_v61 = vsel %vm988_vm2, %v2728_v28, %v2729_v10 }
 0x121   : > { %4349 = vmatmul.mubr.msk.f32.gmra.mrb[4].mxu0 %vm409_vm1, %v5330_v40  ;;  %v6226_v40 = vld [vmem:[#allocation4_spill] sm:$0xff] }
 0x122   : > { %4351 = vmatprep.mubr.msk.f32.mxu0 %vm409_vm1, %v5334_v8  ;;  %v2732_v8 = vsel %vm988_vm2, %v2729_v10, %v2731_v27 }
 0x125   : > { %4352 = vmatmul.mubr.msk.f32.gmra.mrb[6].mxu0 %vm409_vm1, %v5347_v48 }
 0x126   : > { %4354 = vmatprep.mubr.msk.f32.mxu0 %vm409_vm1, %v6180_v60 }
 0x129   : > { %4355 = vmatmul.mubr.msk.f32.gmra.mrb[8].mxu0 %vm409_vm1, %v5364_v56 }
 0x12a   : > { %4357 = vmatprep.mubr.msk.f32.mxu0 %vm409_vm1, %v6181_v38 }
 0x12d   : > { %4358 = vmatmul.mubr.msk.f32.gmra.mrb[10].mxu0 %vm409_vm1, %v5381_v1 }
 0x12e   : > { %4360 = vmatprep.mubr.msk.f32.mxu0 %vm409_vm1, %v6182_v7 }
 0x131   : > { %4361 = vmatmul.mubr.msk.f32.gmra.mrb[12].mxu0 %vm409_vm1, %v5398_v9 }
 0x132   : > { %4363 = vmatprep.mubr.msk.f32.mxu0 %vm409_vm1, %v6183_v14 }
 0x135   : > { %4364 = vmatmul.mubr.msk.f32.gmra.mrb[14].mxu0 %vm409_vm1, %v5415_v6 }
 0x136   : > { %4366 = vmatprep.mubr.msk.f32.mxu0 %vm409_vm1, %v6184_v20 }
 0x139   : > { %4367 = vmatmul.mubr.msk.f32.gmra.mrb[16].mxu0 %vm409_vm1, %v5432_v52 }
 0x13a   : > { %4369 = vmatprep.mubr.msk.f32.mxu0 %vm409_vm1, %v6185_v33 }
 0x13d   : > { %4370 = vmatmul.mubr.msk.f32.gmra.mrb[18].mxu0 %vm409_vm1, %v5449_v13  ;;  %v4758_v13 = vmov 0.00390625  }
 0x13e   : > { %4372 = vmatprep.mubr.msk.f32.mxu0 %vm409_vm1, %v6186_v51  ;;  %3131 = vmatprep.mubr.f32.mxu1 %v4758_v13 }
 0x141   : > { %4373 = vmatmul.mubr.msk.f32.gmra.mrb[20].mxu0 %vm409_vm1, %v5466_v21 }
 0x142   : > { %4375 = vmatprep.mubr.msk.f32.mxu0 %vm409_vm1, %v6187_v59 }
 0x145   : > { %4376 = vmatmul.mubr.msk.f32.gmra.mrb[22].mxu0 %vm409_vm1, %v5483_v62 }
 0x146   : > { %4378 = vmatprep.mubr.msk.f32.mxu0 %vm409_vm1, %v5487_v45 }
 0x149   : > { %4379 = vmatmul.mubr.msk.f32.gmra.mrb[24].mxu0 %vm409_vm1, %v6223_v46 }
 0x14a   : > { %4381 = vmatprep.mubr.msk.f32.mxu0 %vm409_vm1, %v6224_v23 }
 0x14d   : > { %4382 = vmatmul.mubr.msk.f32.gmra.mrb[26].mxu0 %vm409_vm1, %v5517_v37 }
 0x14e   : > { %4384 = vmatprep.mubr.msk.f32.mxu0 %vm409_vm1, %v6225_v43 }
 0x151   : > { %4385 = vmatmul.mubr.msk.f32.gmra.mrb[28].mxu0 %vm409_vm1, %v6226_v40 }
 0x152   : > { %4387 = vmatprep.mubr.msk.f32.mxu0 %vm409_vm1, %v2730_v61 }
 0x155   : > { %4388 = vmatmul.mubr.msk.f32.gmra.mrb[30].mxu0 %vm409_vm1, %v2732_v8 }
 0x1ac   : > { %v4094_v48 = vpop.f32.mrb[0].mxu1 }
 0x1ad   : > { %v1466_v56 = vpop.f32.mrb[1].mxu1 }
 0x1b0   : > { %v4097_v1 = vpop.f32.mrb[2].mxu1 }
 0x1b1   : > { %v1476_v9 = vpop.f32.mrb[3].mxu1 }
 0x1b4   : > { %v4100_v6 = vpop.f32.mrb[4].mxu1 }
 0x1b5   : > { %v1486_v52 = vpop.f32.mrb[5].mxu1 }
 0x1b8   : > { %v4103_v21 = vpop.f32.mrb[6].mxu1 }
 0x1b9   : > { %v1496_v62 = vpop.f32.mrb[7].mxu1 }
 0x1bc   : > { %v4106_v45 = vpop.f32.mrb[8].mxu1 }
 0x1bd   : > { %v1506_v37 = vpop.f32.mrb[9].mxu1 }
 0x1c0   : > { %v5882_v60 = vpop.f32.mrb[10].mxu1 }
 0x1c1   : > { %v5884_v38 = vpop.f32.mrb[11].mxu1 }
 0x1c4   : > { %v5886_v7 = vpop.f32.mrb[12].mxu1 }
 0x1c5   : > { %v5888_v14 = vpop.f32.mrb[13].mxu1 }
 0x1c8   : > { %v5890_v20 = vpop.f32.mrb[14].mxu1 }
 0x1c9   : > { %v5892_v33 = vpop.f32.mrb[15].mxu1 }
 0x1cc   : > { %v5894_v51 = vpop.f32.mrb[16].mxu1 }
 0x1cd   : > { %v5896_v59 = vpop.f32.mrb[17].mxu1 }
 0x1d0   : > { %v5898_v53 = vpop.f32.mrb[18].mxu1 }
 0x1d1   : > { %v5900_v16 = vpop.f32.mrb[19].mxu1 }
 0x1d4   : > { %v5902_v63 = vpop.f32.mrb[20].mxu1 }
 0x1d5   : > { %v5904_v5 = vpop.f32.mrb[21].mxu1 }
 0x1d8   : > { %v5906_v35 = vpop.f32.mrb[22].mxu1 }
 0x1d9   : > { %v5908_v15 = vpop.f32.mrb[23].mxu1 }
 0x1dc   : > { %v5910_v39 = vpop.f32.mrb[24].mxu1 }
 0x1dd   : > { %v5912_v18 = vpop.f32.mrb[25].mxu1 }
 0x1e0   : > { %v5914_v25 = vpop.f32.mrb[26].mxu1 }
 0x1e1   : > { %v5916_v26 = vpop.f32.mrb[27].mxu1 }
 0x1e4   : > { %v5918_v31 = vpop.f32.mrb[28].mxu1 }
 0x1e5   : > { %v5920_v32 = vpop.f32.mrb[29].mxu1 }
 0x1e8   : > { %v5922_v41 = vpop.f32.mrb[30].mxu1 }
 0x1e9   : > { %v5924_v42 = vpop.f32.mrb[31].mxu1 }
 0x1ec   : > { %v4344_v49 = vpop.f32.mrb[0].mxu0 }
 0x1ed   : > { %v4481_v57 = vadd.f32 %v4344_v49, %v4094_v48  ;;  %v2805_v58 = vpop.f32.mrb[1].mxu0 }
 0x1ee   : > { %v4482_v2 = vadd.f32 %v2805_v58, %v1466_v56 }
 0x1ef   : > { %v3004_v3 = vadd.f32 %v4481_v57, %v5929_v50 }
 0x1f0   : > { %v3003_v17 = vadd.f32 %v4482_v2, %v5929_v50  ;;  %v4347_v19 = vpop.f32.mrb[2].mxu0 }
 0x1f1   : > { %v3036_v30 = vmax.f32 %v3004_v3, 0.0  ;;  %v4483_v36 = vadd.f32 %v4347_v19, %v4097_v1  ;;  %v2815_v54 = vpop.f32.mrb[3].mxu0 }
 0x1f2   : > { %v3035_v55 = vmax.f32 %v3003_v17, 0.0  ;;  %v4484_v22 = vadd.f32 %v2815_v54, %v1476_v9 }
 0x1f3   : > { %v3006_v24 = vadd.f32 %v4483_v36, %v5929_v50 }
 0x1f4   : > { %v5934_v4 = vpack.c.bf16 %v3036_v30, %v3035_v55  ;;  %v3005_v44 = vadd.f32 %v4484_v22, %v5929_v50  ;;  %v4350_v29 = vpop.f32.mrb[4].mxu0 }
 0x1f5   : > { %v3038_v47 = vmax.f32 %v3006_v24, 0.0  ;;  %v4485_v0 = vadd.f32 %v4350_v29, %v4100_v6  ;;  %v2825_v34 = vpop.f32.mrb[5].mxu0 }
 0x1f6   : > { %v3037_v11 = vmax.f32 %v3005_v44, 0.0  ;;  %v4486_v12 = vadd.f32 %v2825_v34, %v1486_v52 }
 0x1f7   : > { %v3008_v46 = vadd.f32 %v4485_v0, %v5929_v50 }
 0x1f8   : > { %v5938_v23 = vpack.c.bf16 %v3038_v47, %v3037_v11  ;;  %v3007_v28 = vadd.f32 %v4486_v12, %v5929_v50  ;;  %v4353_v10 = vpop.f32.mrb[6].mxu0 }
 0x1f9   : > { %v3040_v43 = vmax.f32 %v3008_v46, 0.0  ;;  %v4487_v27 = vadd.f32 %v4353_v10, %v4103_v21  ;;  %v2835_v61 = vpop.f32.mrb[7].mxu0 }
 0x1fa   : > { %v3039_v40 = vmax.f32 %v3007_v28, 0.0  ;;  %v4488_v8 = vadd.f32 %v2835_v61, %v1496_v62 }
 0x1fb   : > { %v3010_v48 = vadd.f32 %v4487_v27, %v5929_v50 }
 0x1fc   : > { %v5942_v56 = vpack.c.bf16 %v3040_v43, %v3039_v40  ;;  %v3009_v1 = vadd.f32 %v4488_v8, %v5929_v50  ;;  %v4356_v9 = vpop.f32.mrb[8].mxu0 }
 0x1fd   : > { %v3042_v6 = vmax.f32 %v3010_v48, 0.0  ;;  %v4489_v52 = vadd.f32 %v4356_v9, %v4106_v45  ;;  %v2845_v49 = vpop.f32.mrb[9].mxu0 }
 0x1fe   : > { %v3041_v57 = vmax.f32 %v3009_v1, 0.0  ;;  %v4490_v58 = vadd.f32 %v2845_v49, %v1506_v37 }
 0x1ff   : > { %v3012_v2 = vadd.f32 %v4489_v52, %v5929_v50 }
 0x200   : > { %v5946_v3 = vpack.c.bf16 %v3042_v6, %v3041_v57  ;;  %v3011_v21 = vadd.f32 %v4490_v58, %v5929_v50  ;;  %v4359_v17 = vpop.f32.mrb[10].mxu0 }
 0x201   : > { %v3044_v62 = vmax.f32 %v3012_v2, 0.0  ;;  %v4491_v19 = vadd.f32 %v4359_v17, %v5882_v60  ;;  %v2855_v30 = vpop.f32.mrb[11].mxu0 }
 0x202   : > { %v3043_v36 = vmax.f32 %v3011_v21, 0.0  ;;  %v4492_v54 = vadd.f32 %v2855_v30, %v5884_v38 }
 0x203   : > { %v3014_v55 = vadd.f32 %v4491_v19, %v5929_v50 }
 0x204   : > { %v5952_v45 = vpack.c.bf16 %v3044_v62, %v3043_v36  ;;  %v3013_v37 = vadd.f32 %v4492_v54, %v5929_v50  ;;  %v4362_v22 = vpop.f32.mrb[12].mxu0 }
 0x205   : > { %v3046_v24 = vmax.f32 %v3014_v55, 0.0  ;;  %v4493_v44 = vadd.f32 %v4362_v22, %v5886_v7  ;;  %v2865_v29 = vpop.f32.mrb[13].mxu0 }
 0x206   : > { %v3045_v47 = vmax.f32 %v3013_v37, 0.0  ;;  %v4494_v0 = vadd.f32 %v2865_v29, %v5888_v14 }
 0x207   : > { %v3016_v60 = vadd.f32 %v4493_v44, %v5929_v50 }
 0x208   : > { %v5958_v34 = vpack.c.bf16 %v3046_v24, %v3045_v47  ;;  %v3015_v38 = vadd.f32 %v4494_v0, %v5929_v50  ;;  %v4365_v11 = vpop.f32.mrb[14].mxu0 }
 0x209   : > { %v3048_v12 = vmax.f32 %v3016_v60, 0.0  ;;  %v4495_v46 = vadd.f32 %v4365_v11, %v5890_v20  ;;  %v2875_v28 = vpop.f32.mrb[15].mxu0 }
 0x20a   : > { %v3047_v10 = vmax.f32 %v3015_v38, 0.0  ;;  %v4496_v43 = vadd.f32 %v2875_v28, %v5892_v33 }
 0x20b   : > { %v3018_v7 = vadd.f32 %v4495_v46, %v5929_v50 }
 0x20c   : > { %v5964_v27 = vpack.c.bf16 %v3048_v12, %v3047_v10  ;;  %v3017_v14 = vadd.f32 %v4496_v43, %v5929_v50  ;;  %v4368_v61 = vpop.f32.mrb[16].mxu0 }
 0x20d   : > { %v3050_v40 = vmax.f32 %v3018_v7, 0.0  ;;  %v4497_v8 = vadd.f32 %v4368_v61, %v5894_v51  ;;  %v2885_v48 = vpop.f32.mrb[17].mxu0 }
 0x20e   : > { %v3049_v1 = vmax.f32 %v3017_v14, 0.0  ;;  %v4498_v9 = vadd.f32 %v2885_v48, %v5896_v59 }
 0x20f   : > { %v3020_v20 = vadd.f32 %v4497_v8, %v5929_v50 }
 0x210   : > { %v5970_v6 = vpack.c.bf16 %v3050_v40, %v3049_v1  ;;  %v3019_v33 = vadd.f32 %v4498_v9, %v5929_v50  ;;  %v4371_v52 = vpop.f32.mrb[18].mxu0 }
 0x211   : > { %v3052_v49 = vmax.f32 %v3020_v20, 0.0  ;;  %v4499_v57 = vadd.f32 %v4371_v52, %v5898_v53  ;;  %v2895_v58 = vpop.f32.mrb[19].mxu0 }
 0x212   : > { %v3051_v2 = vmax.f32 %v3019_v33, 0.0  ;;  %v4500_v21 = vadd.f32 %v2895_v58, %v5900_v16 }
 0x213   : > { %v3022_v51 = vadd.f32 %v4499_v57, %v5929_v50 }
 0x214   : > { %v3021_v17 = vadd.f32 %v4500_v21, %v5929_v50  ;;  %v4374_v62 = vpop.f32.mrb[20].mxu0  ;;  %v4425_v59 = vpack.c.bf16 %v3052_v49, %v3051_v2 }
 0x215   : > { %v3054_v19 = vmax.f32 %v3022_v51, 0.0  ;;  %v4501_v30 = vadd.f32 %v4374_v62, %v5902_v63  ;;  %v2905_v36 = vpop.f32.mrb[21].mxu0 }
 0x216   : > { %v3053_v54 = vmax.f32 %v3021_v17, 0.0  ;;  %v4502_v55 = vadd.f32 %v2905_v36, %v5904_v5  ;;  %4426 = vmatprep.subr.bf16.mxu1 %v4425_v59  ;;  %v3139_v59 = vld [vmem:[%s6071_s3 + $0x10] sm:$0xff] }
 0x217   : > { %v3024_v53 = vadd.f32 %v4501_v30, %v5929_v50  ;;  %4428 = vmatpush3.bf16.msra.mxu1 %v5934_v4  ;;  %v3142_v30 = vld [vmem:[%s6071_s3 + $0x28] sm:$0xff] }
 0x218   : > { %v3023_v16 = vadd.f32 %v4502_v55, %v5929_v50  ;;  %v4377_v37 = vpop.f32.mrb[22].mxu0  ;;  %v4429_v22 = vpack.c.bf16 %v3054_v19, %v3053_v54  ;;  %v3143_v54 = vld [vmem:[%s6071_s3 + $0x30] sm:$0xff] }
 0x219   : > { %v3056_v24 = vmax.f32 %v3024_v53, 0.0  ;;  %v4503_v44 = vadd.f32 %v4377_v37, %v5906_v35  ;;  %v2915_v29 = vpop.f32.mrb[23].mxu0  ;;  %v3145_v53 = vld [vmem:[%s6071_s3 + $0x40] sm:$0xff] }
 0x21a   : > { %v3055_v47 = vmax.f32 %v3023_v16, 0.0  ;;  %v4504_v63 = vadd.f32 %v2915_v29, %v5908_v15  ;;  %4430 = vmatprep.subr.bf16.mxu1 %v4429_v22  ;;  %v3146_v16 = vld [vmem:[%s6071_s3 + $0x48] sm:$0xff]  ;;  %v3147_v22 = vld [vmem:[%s6071_s3 + $0x50] sm:$0xff]  ;;  %v3149_v29 = vld [vmem:[%s6071_s3 + $0x60] sm:$0xff] }
 0x21b   : > { %v3026_v0 = vadd.f32 %v4503_v44, %v5929_v50  ;;  %4432 = vmatpush3.bf16.msra.mxu1 %v5938_v23  ;;  %v4470_v37 = vpack.c.bf16 %v3146_v16, %v3145_v53 }
 0x21c   : > { %v3025_v5 = vadd.f32 %v4504_v63, %v5929_v50  ;;  %v4380_v60 = vpop.f32.mrb[24].mxu0  ;;  %v4433_v4 = vpack.c.bf16 %v3056_v24, %v3055_v47  ;;  %v3148_v24 = vld [vmem:[%s6071_s3 + $0x58] sm:$0xff]  ;;  %v3150_v47 = vld [vmem:[%s6071_s3 + $0x68] sm:$0xff] }
 0x21d   : > { %v3058_v38 = vmax.f32 %v3026_v0, 0.0  ;;  %v4505_v11 = vadd.f32 %v4380_v60, %v5910_v39  ;;  %v2925_v12 = vpop.f32.mrb[25].mxu0  ;;  %v4473_v44 = vpack.c.bf16 %v3148_v24, %v3147_v22  ;;  %v4476_v63 = vpack.c.bf16 %v3150_v47, %v3149_v29  ;;  %v3151_v0 = vld [vmem:[%s6071_s3 + $0x70] sm:$0xff] }
 0x21e   : > { %v3057_v46 = vmax.f32 %v3025_v5, 0.0  ;;  %v4506_v35 = vadd.f32 %v2925_v12, %v5912_v18  ;;  %4434 = vmatprep.subr.bf16.mxu1 %v4433_v4  ;;  %v3152_v5 = vld [vmem:[%s6071_s3 + $0x78] sm:$0xff]  ;;  %v4761_v4 = vmov 0.0  }
 0x21f   : > { %v3028_v28 = vadd.f32 %v4505_v11, %v5929_v50  ;;  %4436 = vmatpush3.bf16.msra.mxu1 %v5942_v56  ;;  %v4479_v60 = vpack.c.bf16 %v3152_v5, %v3151_v0 }
 0x220   : > { %v3027_v15 = vadd.f32 %v4506_v35, %v5929_v50  ;;  %v4383_v10 = vpop.f32.mrb[26].mxu0  ;;  %v4437_v23 = vpack.c.bf16 %v3058_v38, %v3057_v46  ;;  %v3588_v46 = vld [vmem:[%s6072_s4] ss:$0 sm:$0xff] }
 0x221   : > { %v3060_v43 = vmax.f32 %v3028_v28, 0.0  ;;  %v4507_v7 = vadd.f32 %v4383_v10, %v5914_v25  ;;  %v2935_v14 = vpop.f32.mrb[27].mxu0 }
 0x222   : > { %v3059_v61 = vmax.f32 %v3027_v15, 0.0  ;;  %v4508_v39 = vadd.f32 %v2935_v14, %v5916_v26  ;;  %4438 = vmatprep.subr.bf16.mxu1 %v4437_v23 }
 0x223   : > { %v3030_v40 = vadd.f32 %v4507_v7, %v5929_v50  ;;  %4440 = vmatpush3.bf16.msra.mxu1 %v5946_v3 }
 0x224   : > { %v3029_v18 = vadd.f32 %v4508_v39, %v5929_v50  ;;  %v4386_v8 = vpop.f32.mrb[28].mxu0  ;;  %v4441_v56 = vpack.c.bf16 %v3060_v43, %v3059_v61 }
 0x225   : > { %v3062_v48 = vmax.f32 %v3030_v40, 0.0  ;;  %v4509_v1 = vadd.f32 %v4386_v8, %v5918_v31  ;;  %v2945_v9 = vpop.f32.mrb[29].mxu0 }
 0x226   : > { %v3061_v20 = vmax.f32 %v3029_v18, 0.0  ;;  %v4510_v25 = vadd.f32 %v2945_v9, %v5920_v32  ;;  %4442 = vmatprep.subr.bf16.mxu1 %v4441_v56 }
 0x227   : > { %v3032_v33 = vadd.f32 %v4509_v1, %v5929_v50  ;;  %4444 = vmatpush3.bf16.msra.mxu1 %v5952_v45 }
 0x228   : > { %v3031_v26 = vadd.f32 %v4510_v25, %v5929_v50  ;;  %v4389_v52 = vpop.f32.mrb[30].mxu0  ;;  %v4445_v3 = vpack.c.bf16 %v3062_v48, %v3061_v20 }
 0x229   : > { %v3064_v49 = vmax.f32 %v3032_v33, 0.0  ;;  %v4511_v57 = vadd.f32 %v4389_v52, %v5922_v41  ;;  %v2955_v58 = vpop.f32.mrb[31].mxu0  ;;  %v3137_v41 = vld [vmem:[%s6071_s3] sm:$0xff] }
 0x22a   : > { %v3063_v2 = vmax.f32 %v3031_v26, 0.0  ;;  %v4512_v31 = vadd.f32 %v2955_v58, %v5924_v42  ;;  %4446 = vmatprep.subr.bf16.mxu1 %v4445_v3  ;;  %v3138_v42 = vld [vmem:[%s6071_s3 + $0x8] sm:$0xff] }
 0x22b   : > { %v3034_v21 = vadd.f32 %v4511_v57, %v5929_v50  ;;  %4448 = vmatpush3.bf16.msra.mxu1 %v5958_v34  ;;  %v4458_v34 = vpack.c.bf16 %v3138_v42, %v3137_v41 }
 0x22c   : > { %v3033_v32 = vadd.f32 %v4512_v31, %v5929_v50  ;;  %v4449_v51 = vpack.c.bf16 %v3064_v49, %v3063_v2  ;;  %v4759_v50 = vmov 0.0|0.0  }
 0x22d   : > { %v3066_v45 = vmax.f32 %v3034_v21, 0.0 }
 0x22e   : > { %v3065_v17 = vmax.f32 %v3033_v32, 0.0  ;;  %4450 = vmatprep.subr.bf16.mxu1 %v4449_v51 }
 0x22f   : > { %4452 = vmatpush3.bf16.msra.mxu1 %v5964_v27  ;;  %v3140_v27 = vld [vmem:[%s6071_s3 + $0x18] sm:$0xff] }
 0x230   : > { %v4453_v62 = vpack.c.bf16 %v3066_v45, %v3065_v17  ;;  %v4461_v19 = vpack.c.bf16 %v3140_v27, %v3139_v59 }
 0x232   : > { %4454 = vmatprep.subr.bf16.mxu1 %v4453_v62 }
 0x233   : > { %4456 = vmatpush3.bf16.msra.mxu1 %v5970_v6  ;;  %v3141_v6 = vld [vmem:[%s6071_s3 + $0x20] sm:$0xff] }
 0x234   : > { %4457 = vmatprep.subr.bf16.mxu1 %v4759_v50  ;;  %v4464_v36 = vpack.c.bf16 %v3142_v30, %v3141_v6 }
 0x236   : > { %3132 = vmatmul.mubr.f32.vlgmr.msra.gmra.mrb[32].mxu1 %v4758_v13  ;;  %v3144_v13 = vld [vmem:[%s6071_s3 + $0x38] sm:$0xff] }
 0x237   : > { %4459 = vmatpush3.bf16.msra.mxu1 %v4458_v34  ;;  %v4467_v55 = vpack.c.bf16 %v3144_v13, %v3143_v54  ;;  %4422 = vmatprep.mubr.msk.f32.mxu1 %vm4760_vm3, %v4761_v4 }
 0x238   : > { %4460 = vmatprep.subr.bf16.mxu1 %v4759_v50 }
 0x23b   : > { %4462 = vmatpush3.bf16.msra.mxu1 %v4461_v19 }
 0x23c   : > { %4463 = vmatprep.subr.bf16.mxu1 %v4759_v50 }
 0x23f   : > { %4465 = vmatpush3.bf16.msra.mxu1 %v4464_v36 }
 0x240   : > { %4466 = vmatprep.subr.bf16.mxu1 %v4759_v50 }
 0x243   : > { %4468 = vmatpush3.bf16.msra.mxu1 %v4467_v55 }
 0x244   : > { %4469 = vmatprep.subr.bf16.mxu1 %v4759_v50 }
 0x247   : > { %4471 = vmatpush3.bf16.msra.mxu1 %v4470_v37 }
 0x248   : > { %4472 = vmatprep.subr.bf16.mxu1 %v4759_v50 }
 0x24b   : > { %4474 = vmatpush3.bf16.msra.mxu1 %v4473_v44 }
 0x24c   : > { %4475 = vmatprep.subr.bf16.mxu1 %v4759_v50 }
 0x24f   : > { %4477 = vmatpush3.bf16.msra.mxu1 %v4476_v63 }
 0x250   : > { %4478 = vmatprep.subr.bf16.mxu1 %v4759_v50 }
 0x253   : > { %4480 = vmatpush3.bf16.msra.mxu1 %v4479_v60 }
 0x309   : > { %v3920_v38 = vpop.f32.mrb[32].mxu1 }
 0x30a   : > { %v3921_v11 = vpop.f32.mrb[33].mxu1 }
 0x30b   : > { %v3922_v12 = vadd.f32 %v3921_v11, %v3920_v38 }
 0x30d   : > { %4423 = vmatmul.mubr.f32.vlgmr.msra.gmra.mrb[34].mxu1 %v3922_v12 }
 0x3e0   : > { %v3226_v35 = vpop.f32.mrb[34].mxu1 }
 0x3e1   : > { %v3227_v28 = vadd.f32 %v3588_v46, %v3226_v35  ;;  %v4424_v15 = vpop.f32.mrb[35].mxu1 }
 0x3e3   : > { %3230 = vst [vmem:[%s222_s10] sm:$0xff] %v3227_v28 }
 0x3e4 PF: > { %s15_s18 = sadd.s32 1, %s4756_s18  }
 0x3e5   : > { %p12_p4 = scmp.ge.s32.totalorder %s15_s18, 4  }
 0x3e7   :  { %14 = sbr.rel (!%p12_p4) target bundleno = 1 (0x1), region = 78 }

</bundles_post_ra>
